<compile_context>
chip_gen: v5e
topology: v5e:2x2
jax: 0.10.0
libtpu: 0.0.40
codegen_flags: <defaults>
</compile_context>

<pallas_src>
import jax
import jax.numpy as jnp
from jax import lax
from jax.experimental import pallas as pl
from jax.experimental.pallas import tpu as pltpu


def _matching_kernel(fiw_ref, ft_ref, b_ref, chan_ref, s_ref):
    """One (batch, L-tile) grid step.

    fiw_ref : (1, 6, TL, K)  template features pre-multiplied by the collapsed
                             projection matrix W (channel-major, matmul dtype)
    ft_ref  : (1, S, K)      target features, K = E*C (matmul dtype)
    b_ref   : (6, S)         composed projection bias, lane-broadcast (f32)
    chan_ref: (1, 5, TL, S)  [angle_x, angle_y, scale, trans_x, trans_y]
    s_ref   : (1, TL, S)     raw (x10) score channel (f32, feeds dual softmax)
    """
    _, _, TL, K = fiw_ref.shape
    S = ft_ref.shape[1]

    # Leading-dim merge (6, TL, K) -> (6*TL, K): layout-free relabel.
    fiw = fiw_ref[0].reshape(6 * TL, K)
    ft = ft_ref[0]                                             # (S, K)

    # Entire projected matching map in ONE MXU contraction with K = E*C:
    #   out[j*TL + l, s] = sum_{e,c} fi[l,e,c] * W[e,j] * ft[s,e,c]
    out = lax.dot_general(fiw, ft, (((1,), (1,)), ((), ())),
                          preferred_element_type=jnp.float32)   # (6*TL, S)
    b = b_ref[...]                                              # (6, S) f32

    # Channel 0: raw score (kept f32 for the dual-softmax epilogue).
    s_ref[0] = out[0 * TL:1 * TL] + b[0]

    # Channels 1..2: F.normalize(angle, dim=-1), fused (single EUP rsqrt).
    ax = out[1 * TL:2 * TL] + b[1]
    ay = out[2 * TL:3 * TL] + b[2]
    inv = lax.rsqrt(jnp.maximum(ax * ax + ay * ay, jnp.float32(1e-24)))
    od = chan_ref.dtype
    chan_ref[0, 0] = (ax * inv).astype(od)
    chan_ref[0, 1] = (ay * inv).astype(od)

    # Channels 3..5: scale / trans_x / trans_y, stored directly (no concat).
    chan_ref[0, 2] = (out[3 * TL:4 * TL] + b[3]).astype(od)
    chan_ref[0, 3] = (out[4 * TL:5 * TL] + b[4]).astype(od)
    chan_ref[0, 4] = (out[5 * TL:6 * TL] + b[5]).astype(od)


def image_registration_matching(feat_init, feat_term, params, *,
                                tile_l=128, matmul_dtype=jnp.bfloat16,
                                map_dtype=jnp.float32):
    """Matching / projection / scoring tail of ImageRegistration.forward.

    map_dtype=jnp.bfloat16 halves the (N,5,L,S) HBM write if the consumer
    accepts bf16 maps; f32 is the semantics-faithful default.
    """
    N, L, E, C = feat_init.shape
    S = feat_term.shape[1]
    K = E * C
    w1, b1, w2, b2, w3, b3 = params

    # --- host-side constant folding (exact: the projection head is purely
    # linear; Dropout is identity in eval) -------------------------------
    #   feat.div(sqrt(C)) on both sides -> 1/C,  matching_map.mul_(10) -> x10,
    #   Linear(E,64) -> Linear(64,64) -> Linear(64,6)  ->  one (E,6) matrix.
    with jax.default_matmul_precision("highest"):
        W = (w1 @ w2 @ w3) * (10.0 / C)                       # (E, 6)
        bias = (((b1 @ w2) + b2) @ w3 + b3) * 10.0            # (1, 6)
    bias_bcast = jnp.broadcast_to(
        bias.reshape(6, 1).astype(jnp.float32), (6, S))

    # Pre-multiply W into the template features: the kernel then needs a single
    # K = E*C contraction per tile (lane-dense K=128 on the demo config).
    fiw = jnp.einsum("nlec,ej->njlec",
                     feat_init.astype(jnp.float32),
                     W.astype(jnp.float32)).reshape(N, 6, L, K).astype(matmul_dtype)
    # Target features: a free reshape (no transpose round-trip through HBM).
    ftf = feat_term.reshape(N, S, K).astype(matmul_dtype)

    # --- L-tile selection: largest multiple-of-8 divisor of L <= tile_l,
    # keeping >=2 total grid steps so the v7x megacore shards work. --------
    tl = L
    for cand in range(min(tile_l, L), 7, -8):
        if L % cand == 0:
            tl = cand
            break
    if N * (L // tl) < 2 and tl % 16 == 0:
        tl //= 2
    n_lt = L // tl

    # --- VMEM: actual per-step need x (double buffering + headroom); a few
    # MiB, well under the 64 MiB/TC budget of v7x. -------------------------
    itm = jnp.dtype(matmul_dtype).itemsize
    itp = jnp.dtype(map_dtype).itemsize
    per_step = (6 * tl + S) * K * itm + 5 * tl * S * itp + tl * S * 4
    vmem_limit = int(min(max(4 * per_step + (1 << 20), 8 << 20), 32 << 20))

    chan, s = pl.pallas_call(
        _matching_kernel,
        out_shape=(
            jax.ShapeDtypeStruct((N, 5, L, S), map_dtype),
            jax.ShapeDtypeStruct((N, L, S), jnp.float32),
        ),
        grid_spec=pltpu.PrefetchScalarGridSpec(
            num_scalar_prefetch=0,
            grid=(N, n_lt),
            in_specs=[
                pl.BlockSpec((1, 6, tl, K), lambda n, i: (n, 0, i, 0)),
                pl.BlockSpec((1, S, K), lambda n, i: (n, 0, 0)),
                pl.BlockSpec((6, S), lambda n, i: (0, 0)),
            ],
            out_specs=[
                pl.BlockSpec((1, 5, tl, S), lambda n, i: (n, 0, i, 0)),
                pl.BlockSpec((1, tl, S), lambda n, i: (n, i, 0)),
            ],
        ),
        compiler_params=pltpu.CompilerParams(
            dimension_semantics=("parallel", "parallel"),
            vmem_limit_bytes=vmem_limit,
        ),
    )(fiw, ftf, bias_bcast)

    # Dual-softmax: softmax over S is row-local, softmax over L spans L-tiles;
    # both are finished here as one fused XLA reduction over the lane-dense
    # raw score.
    # TODO(synk): for very large L*S, emit per-tile column max/sum partials
    #             from the kernel so the axis=1 softmax needs one extra pass.
    score_map = jax.nn.softmax(s, axis=1) * jax.nn.softmax(s, axis=2)

    angle_map = jnp.moveaxis(chan[:, 0:2], 1, -1)    # (N, L, S, 2)
    scale_map = jnp.moveaxis(chan[:, 2:3], 1, -1)    # (N, L, S, 1)
    trans_map = jnp.moveaxis(chan[:, 3:5], 1, -1)    # (N, L, S, 2)
    return {"score_map": score_map, "angle_map": angle_map,
            "scale_map": scale_map, "trans_map": trans_map}


def _reference(feat_init, feat_term, params):
    """Pure-JAX f32 reference mirroring the PyTorch forward (dual_softmax)."""
    with jax.default_matmul_precision("highest"):
        w1, b1, w2, b2, w3, b3 = params
        C = feat_init.shape[-1]
        fi = feat_init / jnp.sqrt(jnp.float32(C))
        ft = feat_term / jnp.sqrt(jnp.float32(C))
        mm = jnp.einsum("nlec,nsec->nlse", fi, ft)
        h = mm @ w1 + b1[0]
        h = h @ w2 + b2[0]
        o = (h @ w3 + b3[0]) * 10.0
        s = o[..., 0]
        score = jax.nn.softmax(s, axis=1) * jax.nn.softmax(s, axis=2)
        ang = o[..., 1:3]
        nrm = jnp.sqrt(jnp.sum(ang * ang, axis=-1, keepdims=True))
        return {
            "score_map": score,
            "angle_map": ang / jnp.maximum(nrm, 1e-12),
            "scale_map": o[..., 3:4],
            "trans_map": o[..., -2:],
            "_angle_norm": nrm,
        }


if __name__ == "__main__":
    # hidden_channel=128, n_rotation=4 -> per-rotation channel C=32, E=nhead=4;
    # template map 16x16 -> L=256 (2 L-tiles), target map 16x8 -> S=128, N=2.
    N, L, S, E, C = 2, 256, 128, 4, 32

    key = jax.random.PRNGKey(0)
    k_fi, k_ft, k1, k2, k3, kb1, kb2, kb3 = jax.random.split(key, 8)
    feat_init = jax.random.normal(k_fi, (N, L, E, C), jnp.float32)
    feat_term = jax.random.normal(k_ft, (N, S, E, C), jnp.float32)

    w1 = jax.random.normal(k1, (E, 64), jnp.float32) * (1.0 / jnp.sqrt(E))
    b1 = jax.random.normal(kb1, (1, 64), jnp.float32) * 0.01
    w2 = jax.random.normal(k2, (64, 64), jnp.float32) * (1.0 / 8.0)
    b2 = jax.random.normal(kb2, (1, 64), jnp.float32) * 0.01
    w3 = jax.random.normal(k3, (64, 6), jnp.float32) * (1.0 / 8.0)
    b3 = jax.random.normal(kb3, (1, 6), jnp.float32) * 0.01
    params = (w1, b1, w2, b2, w3, b3)

    ref = _reference(feat_init, feat_term, params)

    # 1) exact-semantics check: f32 matmul path vs. the f32 reference.
    out = image_registration_matching(feat_init, feat_term, params,
                                      matmul_dtype=jnp.float32,
                                      map_dtype=jnp.float32)
    jax.block_until_ready(out)
    for name in ("score_map", "scale_map", "trans_map"):
        assert out[name].shape == ref[name].shape, name
        assert jnp.allclose(out[name], ref[name], rtol=1e-2, atol=1e-2), name
    # angle normalization is ill-conditioned where the raw angle vector is ~0;
    # exclude only the (vanishingly rare) near-zero-norm positions.
    mask32 = ref["_angle_norm"] > 1e-2
    assert out["angle_map"].shape == ref["angle_map"].shape
    assert jnp.allclose(jnp.where(mask32, out["angle_map"], 0.0),
                        jnp.where(mask32, ref["angle_map"], 0.0),
                        rtol=1e-2, atol=1e-2)

    # 2) default fast path: bf16 MXU operands (f32 accumulate / softmax).
    out_bf = image_registration_matching(feat_init, feat_term, params)
    jax.block_until_ready(out_bf)
    for name in ("score_map", "scale_map", "trans_map"):
        assert jnp.allclose(out_bf[name], ref[name], rtol=1e-1, atol=1e-1), name
    mask = ref["_angle_norm"] > 0.3
    a_k = jnp.where(mask, out_bf["angle_map"], 0.0)
    a_r = jnp.where(mask, ref["angle_map"], 0.0)
    assert jnp.allclose(a_k, a_r, rtol=1e-1, atol=1e-1)

    print("KERNEL_OK")
</pallas_src>

<mosaic_0001>
module attributes {stable_mosaic.version = 11 : i64} {
  func.func @_matching_kernel(%arg0: i32, %arg1: i32, %arg2: memref<1x6x128x128xf32, #tpu.memory_space<vmem>>, %arg3: memref<1x128x128xf32, #tpu.memory_space<vmem>>, %arg4: memref<6x128xf32, #tpu.memory_space<vmem>>, %arg5: memref<1x5x128x128xf32, #tpu.memory_space<vmem>>, %arg6: memref<1x128x128xf32, #tpu.memory_space<vmem>>) attributes {dimension_semantics = [#tpu.dimension_semantics<parallel>, #tpu.dimension_semantics<parallel>], iteration_bounds = array<i64: 2, 2>, scalar_prefetch = 0 : i64, scratch_operands = 0 : i64, tpu.core_type = #tpu.core_type<tc>, window_params = [{transform_indices = @transform_0, window_bounds = array<i64: 1, 6, 128, 128>}, {transform_indices = @transform_1, window_bounds = array<i64: 1, 128, 128>}, {pipeline_mode = #tpu.pipeline_mode<synchronous>, transform_indices = @transform_2, window_bounds = array<i64: 6, 128>}, {transform_indices = @transform_3, window_bounds = array<i64: 1, 5, 128, 128>}, {transform_indices = @transform_4, window_bounds = array<i64: 1, 128, 128>}]} {
    %c0 = arith.constant 0 : index
    %c0_0 = arith.constant 0 : index
    %c0_1 = arith.constant 0 : index
    %c0_2 = arith.constant 0 : index
    %0 = vector.load %arg2[%c0, %c0_0, %c0_1, %c0_2] : memref<1x6x128x128xf32, #tpu.memory_space<vmem>>, vector<1x6x128x128xf32>
    %1 = vector.shape_cast %0 : vector<1x6x128x128xf32> to vector<6x128x128xf32>
    %2 = vector.shape_cast %1 : vector<6x128x128xf32> to vector<768x128xf32>
    %c0_3 = arith.constant 0 : index
    %c0_4 = arith.constant 0 : index
    %c0_5 = arith.constant 0 : index
    %3 = vector.load %arg3[%c0_3, %c0_4, %c0_5] : memref<1x128x128xf32, #tpu.memory_space<vmem>>, vector<1x128x128xf32>
    %4 = vector.shape_cast %3 : vector<1x128x128xf32> to vector<128x128xf32>
    %cst = arith.constant dense<0.000000e+00> : vector<768x128xf32>
    %5 = tpu.matmul %2, %4, %cst {dimension_numbers = #tpu.dot_dimension_numbers<[1], [1], [0], [0], [0, 0, 1, 0], [], []>} : vector<768x128xf32>, vector<128x128xf32>, vector<768x128xf32> -> vector<768x128xf32>
    %c0_6 = arith.constant 0 : index
    %c0_7 = arith.constant 0 : index
    %6 = vector.load %arg4[%c0_6, %c0_7] : memref<6x128xf32, #tpu.memory_space<vmem>>, vector<6x128xf32>
    %7 = vector.extract_strided_slice %5 {offsets = [0, 0], sizes = [128, 128], strides = [1, 1]} : vector<768x128xf32> to vector<128x128xf32>
    %8 = vector.extract_strided_slice %6 {offsets = [0, 0], sizes = [1, 128], strides = [1, 1]} : vector<6x128xf32> to vector<1x128xf32>
    %9 = vector.shape_cast %8 : vector<1x128xf32> to vector<128xf32>
    %10 = vector.shape_cast %9 : vector<128xf32> to vector<1x128xf32>
    %11 = vector.broadcast %10 : vector<1x128xf32> to vector<128x128xf32>
    %12 = arith.addf %7, %11 : vector<128x128xf32>
    %c0_8 = arith.constant 0 : index
    %c0_9 = arith.constant 0 : index
    %c0_10 = arith.constant 0 : index
    %13 = vector.load %arg6[%c0_8, %c0_9, %c0_10] : memref<1x128x128xf32, #tpu.memory_space<vmem>>, vector<1x128x128xf32>
    %14 = vector.shape_cast %13 : vector<1x128x128xf32> to vector<128x128xf32>
    %15 = vector.shape_cast %12 : vector<128x128xf32> to vector<1x128x128xf32>
    tpu.vector_store %arg6[%c0_8, %c0_9, %c0_10], %15 {strides = array<i32>} : memref<1x128x128xf32, #tpu.memory_space<vmem>>, vector<1x128x128xf32>,
    %16 = vector.extract_strided_slice %5 {offsets = [128, 0], sizes = [128, 128], strides = [1, 1]} : vector<768x128xf32> to vector<128x128xf32>
    %17 = vector.extract_strided_slice %6 {offsets = [1, 0], sizes = [1, 128], strides = [1, 1]} : vector<6x128xf32> to vector<1x128xf32>
    %18 = vector.shape_cast %17 : vector<1x128xf32> to vector<128xf32>
    %19 = vector.shape_cast %18 : vector<128xf32> to vector<1x128xf32>
    %20 = vector.broadcast %19 : vector<1x128xf32> to vector<128x128xf32>
    %21 = arith.addf %16, %20 : vector<128x128xf32>
    %22 = vector.extract_strided_slice %5 {offsets = [256, 0], sizes = [128, 128], strides = [1, 1]} : vector<768x128xf32> to vector<128x128xf32>
    %23 = vector.extract_strided_slice %6 {offsets = [2, 0], sizes = [1, 128], strides = [1, 1]} : vector<6x128xf32> to vector<1x128xf32>
    %24 = vector.shape_cast %23 : vector<1x128xf32> to vector<128xf32>
    %25 = vector.shape_cast %24 : vector<128xf32> to vector<1x128xf32>
    %26 = vector.broadcast %25 : vector<1x128xf32> to vector<128x128xf32>
    %27 = arith.addf %22, %26 : vector<128x128xf32>
    %28 = arith.mulf %21, %21 : vector<128x128xf32>
    %29 = arith.mulf %27, %27 : vector<128x128xf32>
    %30 = arith.addf %28, %29 : vector<128x128xf32>
    %cst_11 = arith.constant 1.000000e-24 : f32
    %31 = vector.broadcast %cst_11 : f32 to vector<128x128xf32>
    %32 = arith.maximumf %30, %31 : vector<128x128xf32>
    %33 = math.rsqrt %32 : vector<128x128xf32>
    %34 = arith.mulf %21, %33 : vector<128x128xf32>
    %c0_12 = arith.constant 0 : index
    %c0_13 = arith.constant 0 : index
    %c0_14 = arith.constant 0 : index
    %c0_15 = arith.constant 0 : index
    %35 = vector.load %arg5[%c0_12, %c0_13, %c0_14, %c0_15] : memref<1x5x128x128xf32, #tpu.memory_space<vmem>>, vector<1x1x128x128xf32>
    %36 = vector.shape_cast %35 : vector<1x1x128x128xf32> to vector<128x128xf32>
    %37 = vector.shape_cast %34 : vector<128x128xf32> to vector<1x1x128x128xf32>
    tpu.vector_store %arg5[%c0_12, %c0_13, %c0_14, %c0_15], %37 {strides = array<i32>} : memref<1x5x128x128xf32, #tpu.memory_space<vmem>>, vector<1x1x128x128xf32>,
    %38 = arith.mulf %27, %33 : vector<128x128xf32>
    %c0_16 = arith.constant 0 : index
    %c1 = arith.constant 1 : index
    %c0_17 = arith.constant 0 : index
    %c0_18 = arith.constant 0 : index
    %39 = vector.load %arg5[%c0_16, %c1, %c0_17, %c0_18] : memref<1x5x128x128xf32, #tpu.memory_space<vmem>>, vector<1x1x128x128xf32>
    %40 = vector.shape_cast %39 : vector<1x1x128x128xf32> to vector<128x128xf32>
    %41 = vector.shape_cast %38 : vector<128x128xf32> to vector<1x1x128x128xf32>
    tpu.vector_store %arg5[%c0_16, %c1, %c0_17, %c0_18], %41 {strides = array<i32>} : memref<1x5x128x128xf32, #tpu.memory_space<vmem>>, vector<1x1x128x128xf32>,
    %42 = vector.extract_strided_slice %5 {offsets = [384, 0], sizes = [128, 128], strides = [1, 1]} : vector<768x128xf32> to vector<128x128xf32>
    %43 = vector.extract_strided_slice %6 {offsets = [3, 0], sizes = [1, 128], strides = [1, 1]} : vector<6x128xf32> to vector<1x128xf32>
    %44 = vector.shape_cast %43 : vector<1x128xf32> to vector<128xf32>
    %45 = vector.shape_cast %44 : vector<128xf32> to vector<1x128xf32>
    %46 = vector.broadcast %45 : vector<1x128xf32> to vector<128x128xf32>
    %47 = arith.addf %42, %46 : vector<128x128xf32>
    %c0_19 = arith.constant 0 : index
    %c2 = arith.constant 2 : index
    %c0_20 = arith.constant 0 : index
    %c0_21 = arith.constant 0 : index
    %48 = vector.load %arg5[%c0_19, %c2, %c0_20, %c0_21] : memref<1x5x128x128xf32, #tpu.memory_space<vmem>>, vector<1x1x128x128xf32>
    %49 = vector.shape_cast %48 : vector<1x1x128x128xf32> to vector<128x128xf32>
    %50 = vector.shape_cast %47 : vector<128x128xf32> to vector<1x1x128x128xf32>
    tpu.vector_store %arg5[%c0_19, %c2, %c0_20, %c0_21], %50 {strides = array<i32>} : memref<1x5x128x128xf32, #tpu.memory_space<vmem>>, vector<1x1x128x128xf32>,
    %51 = vector.extract_strided_slice %5 {offsets = [512, 0], sizes = [128, 128], strides = [1, 1]} : vector<768x128xf32> to vector<128x128xf32>
    %52 = vector.extract_strided_slice %6 {offsets = [4, 0], sizes = [1, 128], strides = [1, 1]} : vector<6x128xf32> to vector<1x128xf32>
    %53 = vector.shape_cast %52 : vector<1x128xf32> to vector<128xf32>
    %54 = vector.shape_cast %53 : vector<128xf32> to vector<1x128xf32>
    %55 = vector.broadcast %54 : vector<1x128xf32> to vector<128x128xf32>
    %56 = arith.addf %51, %55 : vector<128x128xf32>
    %c0_22 = arith.constant 0 : index
    %c3 = arith.constant 3 : index
    %c0_23 = arith.constant 0 : index
    %c0_24 = arith.constant 0 : index
    %57 = vector.load %arg5[%c0_22, %c3, %c0_23, %c0_24] : memref<1x5x128x128xf32, #tpu.memory_space<vmem>>, vector<1x1x128x128xf32>
    %58 = vector.shape_cast %57 : vector<1x1x128x128xf32> to vector<128x128xf32>
    %59 = vector.shape_cast %56 : vector<128x128xf32> to vector<1x1x128x128xf32>
    tpu.vector_store %arg5[%c0_22, %c3, %c0_23, %c0_24], %59 {strides = array<i32>} : memref<1x5x128x128xf32, #tpu.memory_space<vmem>>, vector<1x1x128x128xf32>,
    %60 = vector.extract_strided_slice %5 {offsets = [640, 0], sizes = [128, 128], strides = [1, 1]} : vector<768x128xf32> to vector<128x128xf32>
    %61 = vector.extract_strided_slice %6 {offsets = [5, 0], sizes = [1, 128], strides = [1, 1]} : vector<6x128xf32> to vector<1x128xf32>
    %62 = vector.shape_cast %61 : vector<1x128xf32> to vector<128xf32>
    %63 = vector.shape_cast %62 : vector<128xf32> to vector<1x128xf32>
    %64 = vector.broadcast %63 : vector<1x128xf32> to vector<128x128xf32>
    %65 = arith.addf %60, %64 : vector<128x128xf32>
    %c0_25 = arith.constant 0 : index
    %c4 = arith.constant 4 : index
    %c0_26 = arith.constant 0 : index
    %c0_27 = arith.constant 0 : index
    %66 = vector.load %arg5[%c0_25, %c4, %c0_26, %c0_27] : memref<1x5x128x128xf32, #tpu.memory_space<vmem>>, vector<1x1x128x128xf32>
    %67 = vector.shape_cast %66 : vector<1x1x128x128xf32> to vector<128x128xf32>
    %68 = vector.shape_cast %65 : vector<128x128xf32> to vector<1x1x128x128xf32>
    tpu.vector_store %arg5[%c0_25, %c4, %c0_26, %c0_27], %68 {strides = array<i32>} : memref<1x5x128x128xf32, #tpu.memory_space<vmem>>, vector<1x1x128x128xf32>,
    return
  }
  func.func @transform_0(%arg0: i32, %arg1: i32) -> (i32, i32, i32, i32) {
    %c0_i32 = arith.constant 0 : i32
    %c0_i32_0 = arith.constant 0 : i32
    %c0_i32_1 = arith.constant 0 : i32
    return %arg0, %c0_i32, %arg1, %c0_i32_0 : i32, i32, i32, i32
  }
  func.func @transform_1(%arg0: i32, %arg1: i32) -> (i32, i32, i32) {
    %c0_i32 = arith.constant 0 : i32
    %c0_i32_0 = arith.constant 0 : i32
    %c0_i32_1 = arith.constant 0 : i32
    return %arg0, %c0_i32, %c0_i32_0 : i32, i32, i32
  }
  func.func @transform_2(%arg0: i32, %arg1: i32) -> (i32, i32) {
    %c0_i32 = arith.constant 0 : i32
    %c0_i32_0 = arith.constant 0 : i32
    %c0_i32_1 = arith.constant 0 : i32
    return %c0_i32, %c0_i32_0 : i32, i32
  }
  func.func @transform_3(%arg0: i32, %arg1: i32) -> (i32, i32, i32, i32) {
    %c0_i32 = arith.constant 0 : i32
    %c0_i32_0 = arith.constant 0 : i32
    %c0_i32_1 = arith.constant 0 : i32
    return %arg0, %c0_i32, %arg1, %c0_i32_0 : i32, i32, i32, i32
  }
  func.func @transform_4(%arg0: i32, %arg1: i32) -> (i32, i32, i32) {
    %c0_i32 = arith.constant 0 : i32
    %c0_i32_0 = arith.constant 0 : i32
    return %arg0, %arg1, %c0_i32 : i32, i32, i32
  }
}

</mosaic_0001>

<bundles_post_ra>
// kernel: tpu_custom_call.1
= control target key start
LH: loop header
LB: loop body
LE: loop exit
PB: predicated region body
PF: predicated region fallthrough
CT: control target
= control target key end

     0   :  { %s2979_s0 = inlined_call_operand.hbm [shape: f32[2,6,256,128], index: 0, kind: input, shape index: {}]   ;;  %s2980_s1 = inlined_call_operand.hbm [shape: f32[2,128,128], index: 1, kind: input, shape index: {}]   ;;  %s2981_s2 = inlined_call_operand.hbm [shape: f32[6,128], index: 2, kind: input, shape index: {}]   ;;  %s2982_s3 = inlined_call_operand.hbm [shape: f32[2,5,256,128], index: 3, kind: output, shape index: {0}]   ;;  %s2983_s4 = inlined_call_operand.hbm [shape: f32[2,256,128], index: 4, kind: output, shape index: {1}]  }
   0x1   :  { %2996 = sst [smem:[#allocation31_spill]] %s2981_s2 }
   0x2   :  { %2997 = sst [smem:[#allocation32_spill]] %s2982_s3 }
   0x3   :  { %2998 = sst [smem:[#allocation33_spill]] %s2983_s4 }
   0x4   :  { %10 = vsyncpa [#allocation3], 0 }
   0x5   :  { %12 = vsyncpa [#allocation3 + $0x1], 0 }
   0x6   :  { %13 = vsyncpa [#allocation6], 0 }
   0x7   :  { %15 = vsyncpa [#allocation6 + $0x1], 0 }
   0x8   :  { %16 = vsyncpa [#allocation4], 0 }
   0x9   :  { %18 = vsyncpa [#allocation4 + $0x1], 0 }
   0xa   :  { %19 = vsyncpa [#allocation10], 0 }
   0xb   :  { %21 = vsyncpa [#allocation10 + $0x1], 0  ;;  %s1988_s15 = smov 0   ;;  %s1990_s16 = smov 0  }
   0xc   :  { %s1992_s17 = smov 0   ;;  %s1994_s18 = smov 0  }
   0xd   :  { %s1996_s19 = smov 0   ;;  %s1998_s20 = smov 0  }
   0xe   :  { %s2000_s21 = smov 0   ;;  %s2002_s22 = smov 0  }
   0xf   :  { %s2004_s23 = smov 0   ;;  %s2006_s24 = smov 0  }
  0x10   :  { %s2008_s25 = smov 0  }
  0x11 LB: > { %2999 = sst [smem:[#allocation21_spill]] %s1915_s18  ;;  %s2044_s26 = sadd.s32 4294967295, %s1943_s25   ;;  %s1943_s25 = sphi %s2008_s25, %s27_s25   ;;  %s1939_s24 = sphi %s2006_s24, %s3037_s24   ;;  %s1935_s23 = sphi %s2004_s23, %s3029_s23   ;;  %s1931_s22 = sphi %s2002_s22, %s3036_s22   ;;  %s1927_s21 = sphi %s2000_s21, %s3028_s21   ;;  %s1923_s20 = sphi %s1998_s20, %s3027_s20   ;;  %s1919_s19 = sphi %s1996_s19, %s3035_s19   ;;  %s1915_s18 = sphi %s1994_s18, %s3034_s18   ;;  %s1911_s17 = sphi %s1992_s17, %s3033_s17   ;;  %s1907_s16 = sphi %s1990_s16, %s3032_s16   ;;  %s1903_s15 = sphi %s1988_s15, %s3031_s15  }
  0x12   : > { %3000 = sst [smem:[#allocation22_spill]] %s1923_s20  ;;  %s1433_s27 = sadd.s32 4294967294, %s1943_s25  }
  0x13   : > { %3001 = sst [smem:[#allocation23_spill]] %s1931_s22  ;;  %s36_s28 = sadd.s32 1, %s1935_s23 }
  0x14   : > { %3002 = sst [smem:[#allocation24_spill]] %s1935_s23  ;;  %s39_s29 = sadd.s32 1, %s1939_s24 }
  0x15   : > { %p37_p0 = scmp.ge.s32.totalorder %s36_s28, 2  ;;  %s48_s30 = sadd.s32 1, %s1923_s20 }
  0x16   : > { %p55_p1 = scmp.ne.s32.totalorder %s1923_s20, %s1919_s19  ;;  %p56_p2 = scmp.eq.s32.totalorder %s1943_s25, 0 }
  0x17   : > { %s3039_s28 = smov (%p37_p0, %s36_s28), 0  ;;  %s3041_s29 = smov (!%p37_p0, %s39_s29), %s1939_s24 }
  0x18   : > { %3003 = sst [smem:[#allocation25_spill]] %s3039_s28  ;;  %s44_s5 = ssub.s32 %s1935_s23, %s3039_s28 }
  0x19   : > { %p2063_p3 = por %p56_p2, %p55_p1  ;;  %p41_p4 = scmp.ge.s32.totalorder %s3041_s29, 2 }
  0x1a   : > { %p2984_p5 = scmp.ne.s32.totalorder %s1919_s19, %s1915_s18  ;;  %p62_p6 = scmp.eq.s32.totalorder %s2044_s26, 0 }
  0x1b   : > { %s74_s7 = sadd.s32 1, %s1911_s17  ;;  %s3043_s29 = smov (%p41_p4, %s3041_s29), 0 }
  0x1c   : > { %3005 = sst [smem:[#allocation26_spill]] %s3043_s29  ;;  %p2078_p7 = por %p62_p6, %p2984_p5 }
  0x1d   : > { %p81_p8 = scmp.ne.s32.totalorder %s1911_s17, %s1907_s16  ;;  %s43_s9 = ssub.s32 %s1939_s24, %s3043_s29 }
  0x1e   : > { %s3006_s8 = scalar_select %p2078_p7, 1, 0 }
  0x1f   : > { %p87_p9 = scmp.ne.s32.totalorder %s1907_s16, %s1903_s15  ;;  %s45_s10 = sor.u32 %s44_s5, %s43_s9 }
  0x20   : > { %p72_p10 = scmp.eq.s32.totalorder %s43_s9, 0  ;;  %p46_p11 = scmp.eq.s32.totalorder %s45_s10, 0 }
  0x21   : > { %p2090_p12 = por %p81_p8, %p56_p2  ;;  %p2102_p13 = por %p87_p9, %p62_p6 }
  0x22   : > { %s2095_s12 = scalar_select %p72_p10, %s1911_s17, %s74_s7  }
  0x23   : > { %s2098_s13 = scalar_select %p46_p11, %s1923_s20, %s48_s30  }
  0x24   : > { %3008 = sst [smem:[#allocation27_spill]] %s2095_s12  ;;  %p134_p0 = scmp.eq.s32.totalorder %s2044_s26, 3 }
  0x25   : > { %3009 = sst [smem:[#allocation28_spill]] %s2098_s13  ;;  %p140_p4 = scmp.eq.s32.totalorder %s1433_s27, 3 }
  0x26   : > { %p1434_p5 = scmp.ge.s32.totalorder %s1943_s25, 1  ;;  %p2111_p7 = por %p134_p0, %p55_p1 }
  0x27   : > { %p175_p2 = scmp.lt.s32.totalorder %s1943_s25, 5  ;;  %p3013_p8 = scmp.ne.s32.totalorder %s1919_s19, %s1915_s18 }
  0x28   : > { %s3011_s15 = scalar_select %p2111_p7, 1, 0 }
  0x29   : > { %p2119_p10 = por %p140_p4, %p3013_p8  ;;  %p2123_p11 = pnand %p1434_p5, %p175_p2 }
  0x2a   : > { %3012 = sst [smem:[#allocation29_spill]] %s3011_s15  ;;  %s1945_s10 = smov [#allocation7]  }
  0x2b   : > { %s3014_s5 = scalar_select %p2119_p10, 1, 0 }
  0x2c   : > { %s3017_s2 = sld [smem:[#allocation31_spill]]  ;;  %p1599_p1 = pneg %p2123_p11 }
  0x2d   : > { %3015 = sst [smem:[#allocation30_spill]] %s3014_s5  ;;  %s189_s29 = sshll.u32 %s1945_s10, 4  ;;  %s190_s29 = int_to_ptr.vmem [resolvable:$true] %s189_s29 }
  0x2e   : > { %p1600_p9 = pnand %p1599_p1, %p62_p6  ;;  %p1436_p0 = scmp.ge.s32.totalorder %s1943_s25, 4 }
  0x30   : > { %196 = sbr.rel (%p1436_p0) target bundleno = 75 (0x4b), region = 20 }
  0x32   : > { %s187_s27 = sshll.u32 %s3017_s2, 4  ;;  %s188_s27 = int_to_ptr.hbm [resolvable:$true] %s187_s27 }
  0x33   : > { %1602 = dma.hbm_to_vmem [thread:$0]  (!%p1600_p9), %s188_s27, 128, %s190_s29, [#allocation6]  }
  0x35   : > { %s200_s7 = sand.u32 1, %s1923_s20   ;;  %s1437_s2 = sshll.u32 %s1935_s23, 4 }
  0x36   : > { %s1569_s9 = smul.u32 768, %s200_s7  ;;  %s1946_s10 = smov 4096  }
  0x37   : > { %s1570_s28 = smul.u32 192, %s1939_s24  ;;  %1577 = sst [smem:[#allocation12]] (%p2063_p3), %s1946_s10 }
  0x38   : > { %s1576_s18 = scalar_select %p2063_p3, [#allocation0], [#allocation15] }
  0x39   : > { %s209_s13 = sadd.s32 %s1570_s28, %s1437_s2  ;;  %s204_s4 = scalar_lea.vmem [#allocation2], %s1569_s9 }
  0x3a   : > { %s1438_s29 = sshll.u32 %s209_s13, 3  ;;  %s226_s20 = sshll.u32 %s204_s4, 4  ;;  %s227_s20 = int_to_ptr.vmem [resolvable:$true] %s226_s20 }
  0x3b   : > { %s211_s5 = scalar_lea.hbm %s2979_s0, %s1438_s29  ;;  %s1947_s3 = smov 2048  }
  0x3c   : > { %1578 = sst [smem:[#allocation12 + $0x1]] (%p2063_p3), %s1947_s3  ;;  %s224_s15 = sshll.u32 %s211_s5, 4  ;;  %s225_s15 = int_to_ptr.hbm [resolvable:$true] %s224_s15 }
  0x3d   : > { %s216_s23 = sld [smem:[%s1576_s18]]   ;;  %s1948_s22 = smov 16  }
  0x3e   : > { %1579 = sst [smem:[#allocation12 + $0x2]] (%p2063_p3), %s1948_s22  ;;  %s1949_s2 = smov 128  }
  0x3f   : > { %1580 = sst [smem:[#allocation12 + $0x3]] (%p2063_p3), %s1949_s2  ;;  %s1950_s28 = smov 8  }
  0x40   : > { %1581 = sst [smem:[#allocation12 + $0x4]] (%p2063_p3), %s1949_s2  ;;  %s201_s13 = scalar_lea.sflag [#allocation3], %s200_s7 }
  0x41   : > { %1582 = sst [smem:[#allocation12 + $0x5]] (%p2063_p3), %s1950_s28  ;;  %s1951_s3 = smov [#allocation11]  }
  0x42   : > { %s249_s18 = sand.u32 1, %s1943_s25   ;;  %s251_s22 = sand.u32 1, %s1911_s17  }
  0x43   : > { %s1439_s4 = sshll.u32 %s216_s23, 26  ;;  %s1441_s5 = sshll.u32 %s251_s22, 7 }
  0x44   : > { %s1440_s12 = sadd.s32 134217728, %s1439_s4  ;;  %s1520_s9 = sshll.u32 %s1939_s24, 7 }
  0x45   : > { %1583 = dma.general (%p2063_p3), %s225_s15, 12288, %s227_s20, %s201_s13, %s1951_s3, [#allocation12], %s1440_s12, 0  }
  0x46   : > { %s258_s27 = scalar_lea.hbm %s2980_s1, %s1520_s9  ;;  %s253_s2 = scalar_lea.vmem [#allocation5], %s1441_s5 }
  0x47   : > { %s261_s28 = sshll.u32 %s253_s2, 4  ;;  %s259_s23 = sshll.u32 %s258_s27, 4  ;;  %s262_s28 = int_to_ptr.vmem [resolvable:$true] %s261_s28  ;;  %s260_s23 = int_to_ptr.hbm [resolvable:$true] %s259_s23 }
  0x48   : > { %s250_s7 = scalar_lea.sflag [#allocation6], %s249_s18  ;;  %s1952_s6 = smov 128  }
  0x49   : > { %s1953_s20 = smov 8  }
  0x4a   : > { %1584 = dma.hbm_to_vmem [thread:$0]  (%p2090_p12), %s260_s23, 2048, %s262_s28, %s250_s7, %s1952_s6, %s1952_s6, %s1953_s20  }
  0x4b PF: > { %273 = sbr.rel (%p2123_p11) target bundleno = 532 (0x214), region = 32  ;;  %s2168_s15 = sand.u32 (!%p2123_p11), 1, %s1919_s19  }
  0x4c   : > { %s1571_s4 = smul.u32 (!%p2123_p11), 768, %s2168_s15  ;;  %s276_s12 = scalar_lea.sflag (!%p2123_p11), [#allocation3], %s2168_s15 }
  0x4d   : > { %p3018_p3 = scmp.ne.s32.totalorder (!%p2123_p11), %s3006_s8, 0 }
  0x4e   : > { %s2172_s13 = scalar_lea.vmem (!%p2123_p11), [#allocation2], %s1571_s4 }
  0x50   : > { %1882 = dma.done.wait (%p3018_p3), %s276_s12, 12288  }
  0x51   : > { %1884 = vsyncadd (%p3018_p3), %s276_s12, 4294955008  ;;  %s285_s11 = sand.u32 1, %s2044_s26   ;;  %s287_s30 = sand.u32 1, %s1907_s16  }
  0x52   : > { %s1445_s3 = sshll.u32 %s287_s30, 7  ;;  %s286_s18 = scalar_lea.sflag [#allocation6], %s285_s11 }
  0x53   : > { %s2180_s22 = scalar_lea.vmem [#allocation5], %s1445_s3 }
  0x54   : > { %1886 = dma.done.wait (%p2102_p13), %s286_s18, 2048  }
  0x55   : > { %1888 = vsyncadd (%p2102_p13), %s286_s18, 4294965248 }
  0x56   : > { %1890 = dma.done.wait (%p62_p6), [#allocation6], 128  }
  0x57   : > { %1892 = vsyncadd (%p62_p6), [#allocation6], 4294967168  ;;  %v444_v0 = vld [vmem:[%s2180_s22 + $0x78] sm:$0xff]  ;;  %v443_v1 = vld [vmem:[%s2180_s22 + $0x70] sm:$0xff]  ;;  %s1447_s26 = sshll.u32 %s2168_s15, 7  ;;  %s1572_s14 = smul.u32 640, %s2168_s15 }
  0x58   : > { %445 = vmatpush.xpose.msra.mxu0 %v444_v0  ;;  %1521 = vmatpush.xpose.msra.mxu1 %v444_v0  ;;  %v442_v2 = vld [vmem:[%s2180_s22 + $0x68] sm:$0xff]  ;;  %v441_v3 = vld [vmem:[%s2180_s22 + $0x60] sm:$0xff]  ;;  %v440_v4 = vld [vmem:[%s2180_s22 + $0x58] sm:$0xff]  ;;  %s2283_s8 = scalar_lea.vmem [#allocation9], %s1447_s26  ;;  %s1210_s9 = scalar_lea.sflag [#allocation4], %s2168_s15 }
  0x59   : > { %1522 = vmatpush.xpose.msra.mxu2 %v444_v0  ;;  %1523 = vmatpush.xpose.msra.mxu3 %v444_v0  ;;  %v439_v5 = vld [vmem:[%s2180_s22 + $0x50] sm:$0xff]  ;;  %v438_v6 = vld [vmem:[%s2180_s22 + $0x48] sm:$0xff]  ;;  %v437_v7 = vld [vmem:[%s2180_s22 + $0x40] sm:$0xff]  ;;  %s2302_s5 = scalar_lea.vmem [#allocation8], %s1572_s14  ;;  %s1215_s10 = scalar_lea.sflag [#allocation10], %s2168_s15 }
  0x5a   : > { %v436_v8 = vld [vmem:[%s2180_s22 + $0x38] sm:$0xff]  ;;  %v435_v9 = vld [vmem:[%s2180_s22 + $0x30] sm:$0xff]  ;;  %v434_v10 = vld [vmem:[%s2180_s22 + $0x28] sm:$0xff] }
  0x5b   : > { %v433_v11 = vld [vmem:[%s2180_s22 + $0x20] sm:$0xff]  ;;  %v432_v12 = vld [vmem:[%s2180_s22 + $0x18] sm:$0xff]  ;;  %v431_v13 = vld [vmem:[%s2180_s22 + $0x10] sm:$0xff] }
  0x5c   : > { %446 = vmatpush.xpose.msra.mxu0 %v443_v1  ;;  %1524 = vmatpush.xpose.msra.mxu1 %v443_v1  ;;  %v430_v14 = vld [vmem:[%s2180_s22 + $0x8] sm:$0xff]  ;;  %v429_v15 = vld [vmem:[%s2180_s22] sm:$0xff]  ;;  %v335_v24 = vld [vmem:[%s2172_s13 + $0x10] sm:$0xff] }
  0x5d   : > { %1525 = vmatpush.xpose.msra.mxu2 %v443_v1  ;;  %1526 = vmatpush.xpose.msra.mxu3 %v443_v1  ;;  %v333_v16 = vld [vmem:[%s2172_s13] sm:$0xff]  ;;  %v334_v20 = vld [vmem:[%s2172_s13 + $0x8] sm:$0xff]  ;;  %v359_v25 = vld [vmem:[%s2172_s13 + $0xd0] sm:$0xff] }
  0x5e   : > { %v357_v17 = vld [vmem:[%s2172_s13 + $0xc0] sm:$0xff]  ;;  %v358_v21 = vld [vmem:[%s2172_s13 + $0xc8] sm:$0xff]  ;;  %v383_v26 = vld [vmem:[%s2172_s13 + $0x190] sm:$0xff] }
  0x5f   : > { %v381_v18 = vld [vmem:[%s2172_s13 + $0x180] sm:$0xff]  ;;  %v382_v22 = vld [vmem:[%s2172_s13 + $0x188] sm:$0xff]  ;;  %v407_v27 = vld [vmem:[%s2172_s13 + $0x250] sm:$0xff] }
  0x60   : > { %447 = vmatpush.xpose.msra.mxu0 %v442_v2  ;;  %1527 = vmatpush.xpose.msra.mxu1 %v442_v2  ;;  %v405_v19 = vld [vmem:[%s2172_s13 + $0x240] sm:$0xff]  ;;  %v406_v23 = vld [vmem:[%s2172_s13 + $0x248] sm:$0xff]  ;;  %v336_v28 = vld [vmem:[%s2172_s13 + $0x18] sm:$0xff] }
  0x61   : > { %1528 = vmatpush.xpose.msra.mxu2 %v442_v2  ;;  %1529 = vmatpush.xpose.msra.mxu3 %v442_v2  ;;  %v360_v29 = vld [vmem:[%s2172_s13 + $0xd8] sm:$0xff]  ;;  %v337_v32 = vld [vmem:[%s2172_s13 + $0x20] sm:$0xff]  ;;  %v338_v36 = vld [vmem:[%s2172_s13 + $0x28] sm:$0xff] }
  0x62   : > { %v384_v30 = vld [vmem:[%s2172_s13 + $0x198] sm:$0xff]  ;;  %v361_v33 = vld [vmem:[%s2172_s13 + $0xe0] sm:$0xff]  ;;  %v362_v37 = vld [vmem:[%s2172_s13 + $0xe8] sm:$0xff] }
  0x63   : > { %v408_v31 = vld [vmem:[%s2172_s13 + $0x258] sm:$0xff]  ;;  %v385_v34 = vld [vmem:[%s2172_s13 + $0x1a0] sm:$0xff]  ;;  %v386_v38 = vld [vmem:[%s2172_s13 + $0x1a8] sm:$0xff] }
  0x64   : > { %448 = vmatpush.xpose.msra.mxu0 %v441_v3  ;;  %1530 = vmatpush.xpose.msra.mxu1 %v441_v3  ;;  %v409_v35 = vld [vmem:[%s2172_s13 + $0x260] sm:$0xff]  ;;  %v410_v39 = vld [vmem:[%s2172_s13 + $0x268] sm:$0xff]  ;;  %v339_v40 = vld [vmem:[%s2172_s13 + $0x30] sm:$0xff] }
  0x65   : > { %1531 = vmatpush.xpose.msra.mxu2 %v441_v3  ;;  %1532 = vmatpush.xpose.msra.mxu3 %v441_v3  ;;  %v363_v41 = vld [vmem:[%s2172_s13 + $0xf0] sm:$0xff]  ;;  %v340_v44 = vld [vmem:[%s2172_s13 + $0x38] sm:$0xff]  ;;  %v341_v48 = vld [vmem:[%s2172_s13 + $0x40] sm:$0xff] }
  0x66   : > { %v387_v42 = vld [vmem:[%s2172_s13 + $0x1b0] sm:$0xff]  ;;  %v364_v45 = vld [vmem:[%s2172_s13 + $0xf8] sm:$0xff]  ;;  %v365_v49 = vld [vmem:[%s2172_s13 + $0x100] sm:$0xff] }
  0x67   : > { %v411_v43 = vld [vmem:[%s2172_s13 + $0x270] sm:$0xff]  ;;  %v388_v46 = vld [vmem:[%s2172_s13 + $0x1b8] sm:$0xff]  ;;  %v389_v50 = vld [vmem:[%s2172_s13 + $0x1c0] sm:$0xff] }
  0x68   : > { %449 = vmatpush.xpose.msra.mxu0 %v440_v4  ;;  %1533 = vmatpush.xpose.msra.mxu1 %v440_v4  ;;  %v412_v47 = vld [vmem:[%s2172_s13 + $0x278] sm:$0xff]  ;;  %v413_v51 = vld [vmem:[%s2172_s13 + $0x280] sm:$0xff]  ;;  %v342_v52 = vld [vmem:[%s2172_s13 + $0x48] sm:$0xff] }
  0x69   : > { %1534 = vmatpush.xpose.msra.mxu2 %v440_v4  ;;  %1535 = vmatpush.xpose.msra.mxu3 %v440_v4  ;;  %v366_v53 = vld [vmem:[%s2172_s13 + $0x108] sm:$0xff]  ;;  %v343_v56 = vld [vmem:[%s2172_s13 + $0x50] sm:$0xff]  ;;  %v344_v60 = vld [vmem:[%s2172_s13 + $0x58] sm:$0xff] }
  0x6a   : > { %v390_v54 = vld [vmem:[%s2172_s13 + $0x1c8] sm:$0xff]  ;;  %v367_v57 = vld [vmem:[%s2172_s13 + $0x110] sm:$0xff]  ;;  %v368_v61 = vld [vmem:[%s2172_s13 + $0x118] sm:$0xff] }
  0x6b   : > { %v414_v55 = vld [vmem:[%s2172_s13 + $0x288] sm:$0xff]  ;;  %v391_v58 = vld [vmem:[%s2172_s13 + $0x1d0] sm:$0xff]  ;;  %v392_v62 = vld [vmem:[%s2172_s13 + $0x1d8] sm:$0xff] }
  0x6c   : > { %450 = vmatpush.xpose.msra.mxu0 %v439_v5  ;;  %1536 = vmatpush.xpose.msra.mxu1 %v439_v5  ;;  %v415_v59 = vld [vmem:[%s2172_s13 + $0x290] sm:$0xff]  ;;  %v416_v63 = vld [vmem:[%s2172_s13 + $0x298] sm:$0xff]  ;;  %v345_v0 = vld [vmem:[%s2172_s13 + $0x60] sm:$0xff] }
  0x6d   : > { %1537 = vmatpush.xpose.msra.mxu2 %v439_v5  ;;  %1538 = vmatpush.xpose.msra.mxu3 %v439_v5  ;;  %v369_v1 = vld [vmem:[%s2172_s13 + $0x120] sm:$0xff]  ;;  %v346_v4 = vld [vmem:[%s2172_s13 + $0x68] sm:$0xff] }
  0x6e   : > { %v393_v2 = vld [vmem:[%s2172_s13 + $0x1e0] sm:$0xff]  ;;  %v370_v5 = vld [vmem:[%s2172_s13 + $0x128] sm:$0xff] }
  0x6f   : > { %v417_v3 = vld [vmem:[%s2172_s13 + $0x2a0] sm:$0xff] }
  0x70   : > { %451 = vmatpush.xpose.msra.mxu0 %v438_v6  ;;  %1539 = vmatpush.xpose.msra.mxu1 %v438_v6 }
  0x71   : > { %1540 = vmatpush.xpose.msra.mxu2 %v438_v6  ;;  %1541 = vmatpush.xpose.msra.mxu3 %v438_v6  ;;  %v394_v6 = vld [vmem:[%s2172_s13 + $0x1e8] sm:$0xff] }
  0x74   : > { %452 = vmatpush.xpose.msra.mxu0 %v437_v7  ;;  %1542 = vmatpush.xpose.msra.mxu1 %v437_v7 }
  0x75   : > { %1543 = vmatpush.xpose.msra.mxu2 %v437_v7  ;;  %1544 = vmatpush.xpose.msra.mxu3 %v437_v7  ;;  %v418_v7 = vld [vmem:[%s2172_s13 + $0x2a8] sm:$0xff] }
  0x78   : > { %453 = vmatpush.xpose.msra.mxu0 %v436_v8  ;;  %1545 = vmatpush.xpose.msra.mxu1 %v436_v8 }
  0x79   : > { %1546 = vmatpush.xpose.msra.mxu2 %v436_v8  ;;  %1547 = vmatpush.xpose.msra.mxu3 %v436_v8  ;;  %v347_v8 = vld [vmem:[%s2172_s13 + $0x70] sm:$0xff] }
  0x7c   : > { %454 = vmatpush.xpose.msra.mxu0 %v435_v9  ;;  %1548 = vmatpush.xpose.msra.mxu1 %v435_v9 }
  0x7d   : > { %1549 = vmatpush.xpose.msra.mxu2 %v435_v9  ;;  %1550 = vmatpush.xpose.msra.mxu3 %v435_v9  ;;  %v371_v9 = vld [vmem:[%s2172_s13 + $0x130] sm:$0xff] }
  0x80   : > { %455 = vmatpush.xpose.msra.mxu0 %v434_v10  ;;  %1551 = vmatpush.xpose.msra.mxu1 %v434_v10 }
  0x81   : > { %1552 = vmatpush.xpose.msra.mxu2 %v434_v10  ;;  %1553 = vmatpush.xpose.msra.mxu3 %v434_v10  ;;  %v395_v10 = vld [vmem:[%s2172_s13 + $0x1f0] sm:$0xff] }
  0x84   : > { %456 = vmatpush.xpose.msra.mxu0 %v433_v11  ;;  %1554 = vmatpush.xpose.msra.mxu1 %v433_v11 }
  0x85   : > { %1555 = vmatpush.xpose.msra.mxu2 %v433_v11  ;;  %1556 = vmatpush.xpose.msra.mxu3 %v433_v11  ;;  %v419_v11 = vld [vmem:[%s2172_s13 + $0x2b0] sm:$0xff] }
  0x88   : > { %457 = vmatpush.xpose.msra.mxu0 %v432_v12  ;;  %1557 = vmatpush.xpose.msra.mxu1 %v432_v12 }
  0x89   : > { %1558 = vmatpush.xpose.msra.mxu2 %v432_v12  ;;  %1559 = vmatpush.xpose.msra.mxu3 %v432_v12  ;;  %v348_v12 = vld [vmem:[%s2172_s13 + $0x78] sm:$0xff] }
  0x8c   : > { %458 = vmatpush.xpose.msra.mxu0 %v431_v13  ;;  %1560 = vmatpush.xpose.msra.mxu1 %v431_v13 }
  0x8d   : > { %1561 = vmatpush.xpose.msra.mxu2 %v431_v13  ;;  %1562 = vmatpush.xpose.msra.mxu3 %v431_v13  ;;  %v372_v13 = vld [vmem:[%s2172_s13 + $0x138] sm:$0xff] }
  0x90   : > { %459 = vmatpush.xpose.msra.mxu0 %v430_v14  ;;  %1563 = vmatpush.xpose.msra.mxu1 %v430_v14 }
  0x91   : > { %1564 = vmatpush.xpose.msra.mxu2 %v430_v14  ;;  %1565 = vmatpush.xpose.msra.mxu3 %v430_v14  ;;  %v396_v14 = vld [vmem:[%s2172_s13 + $0x1f8] sm:$0xff] }
  0x94   : > { %460 = vmatpush.xpose.msra.mxu0 %v429_v15  ;;  %1566 = vmatpush.xpose.msra.mxu1 %v429_v15 }
  0x95   : > { %1567 = vmatpush.xpose.msra.mxu2 %v429_v15  ;;  %1568 = vmatpush.xpose.msra.mxu3 %v429_v15  ;;  %v420_v15 = vld [vmem:[%s2172_s13 + $0x2b8] sm:$0xff] }
  0x97   : > { %461 = vmatmul.f32.vlgmr.msra.gmra.mxu0 %v333_v16  ;;  %533 = vmatmul.f32.vlgmr.msra.gmra.mxu1 %v357_v17  ;;  %v2270_v16 = vld [vmem:[#allocation7] sm:$0x3f] }
  0x98   : > { %605 = vmatmul.f32.vlgmr.msra.gmra.mxu2 %v381_v18  ;;  %677 = vmatmul.f32.vlgmr.msra.gmra.mxu3 %v405_v19  ;;  %v2274_v17 = vperm.slane %v2270_v16, 0 }
  0x9f   : > { %464 = vmatmul.f32.gmra.mxu0 %v334_v20  ;;  %536 = vmatmul.f32.gmra.mxu1 %v358_v21  ;;  %v349_v20 = vld [vmem:[%s2172_s13 + $0x80] sm:$0xff] }
  0xa0   : > { %608 = vmatmul.f32.gmra.mxu2 %v382_v22  ;;  %680 = vmatmul.f32.gmra.mxu3 %v406_v23  ;;  %v373_v21 = vld [vmem:[%s2172_s13 + $0x140] sm:$0xff] }
  0xa1   : > { %v397_v23 = vld [vmem:[%s2172_s13 + $0x200] sm:$0xff] }
  0xa7   : > { %467 = vmatmul.f32.gmra.mxu0 %v335_v24  ;;  %539 = vmatmul.f32.gmra.mxu1 %v359_v25  ;;  %v421_v24 = vld [vmem:[%s2172_s13 + $0x2c0] sm:$0xff]  ;;  %v2288_v25 = vperm.slane %v2270_v16, 3 }
  0xa8   : > { %611 = vmatmul.f32.gmra.mxu2 %v383_v26  ;;  %683 = vmatmul.f32.gmra.mxu3 %v407_v27  ;;  %v2291_v26 = vperm.slane %v2270_v16, 4 }
  0xaf   : > { %470 = vmatmul.f32.gmra.mxu0 %v336_v28  ;;  %542 = vmatmul.f32.gmra.mxu1 %v360_v29 }
  0xb0   : > { %614 = vmatmul.f32.gmra.mxu2 %v384_v30  ;;  %686 = vmatmul.f32.gmra.mxu3 %v408_v31  ;;  %v350_v31 = vld [vmem:[%s2172_s13 + $0x88] sm:$0xff] }
  0xb7   : > { %473 = vmatmul.f32.gmra.mxu0 %v337_v32  ;;  %545 = vmatmul.f32.gmra.mxu1 %v361_v33  ;;  %v374_v32 = vld [vmem:[%s2172_s13 + $0x148] sm:$0xff] }
  0xb8   : > { %617 = vmatmul.f32.gmra.mxu2 %v385_v34  ;;  %689 = vmatmul.f32.gmra.mxu3 %v409_v35 }
  0xbf   : > { %476 = vmatmul.f32.gmra.mxu0 %v338_v36  ;;  %548 = vmatmul.f32.gmra.mxu1 %v362_v37  ;;  %v398_v36 = vld [vmem:[%s2172_s13 + $0x208] sm:$0xff] }
  0xc0   : > { %620 = vmatmul.f32.gmra.mxu2 %v386_v38  ;;  %692 = vmatmul.f32.gmra.mxu3 %v410_v39  ;;  %v422_v37 = vld [vmem:[%s2172_s13 + $0x2c8] sm:$0xff] }
  0xc7   : > { %479 = vmatmul.f32.gmra.mxu0 %v339_v40  ;;  %551 = vmatmul.f32.gmra.mxu1 %v363_v41 }
  0xc8   : > { %623 = vmatmul.f32.gmra.mxu2 %v387_v42  ;;  %695 = vmatmul.f32.gmra.mxu3 %v411_v43  ;;  %v351_v42 = vld [vmem:[%s2172_s13 + $0x90] sm:$0xff] }
  0xc9   : > { %v375_v43 = vld [vmem:[%s2172_s13 + $0x150] sm:$0xff] }
  0xcf   : > { %482 = vmatmul.f32.gmra.mxu0 %v340_v44  ;;  %554 = vmatmul.f32.gmra.mxu1 %v364_v45 }
  0xd0   : > { %626 = vmatmul.f32.gmra.mxu2 %v388_v46  ;;  %698 = vmatmul.f32.gmra.mxu3 %v412_v47  ;;  %v399_v47 = vld [vmem:[%s2172_s13 + $0x210] sm:$0xff] }
  0xd7   : > { %485 = vmatmul.f32.gmra.mxu0 %v341_v48  ;;  %557 = vmatmul.f32.gmra.mxu1 %v365_v49  ;;  %v423_v48 = vld [vmem:[%s2172_s13 + $0x2d0] sm:$0xff] }
  0xd8   : > { %629 = vmatmul.f32.gmra.mxu2 %v389_v50  ;;  %701 = vmatmul.f32.gmra.mxu3 %v413_v51 }
  0xdf   : > { %488 = vmatmul.f32.gmra.mxu0 %v342_v52  ;;  %560 = vmatmul.f32.gmra.mxu1 %v366_v53  ;;  %v352_v53 = vld [vmem:[%s2172_s13 + $0x98] sm:$0xff] }
  0xe0   : > { %632 = vmatmul.f32.gmra.mxu2 %v390_v54  ;;  %704 = vmatmul.f32.gmra.mxu3 %v414_v55  ;;  %v376_v54 = vld [vmem:[%s2172_s13 + $0x158] sm:$0xff] }
  0xe7   : > { %491 = vmatmul.f32.gmra.mxu0 %v343_v56  ;;  %563 = vmatmul.f32.gmra.mxu1 %v367_v57 }
  0xe8   : > { %635 = vmatmul.f32.gmra.mxu2 %v391_v58  ;;  %707 = vmatmul.f32.gmra.mxu3 %v415_v59  ;;  %v400_v58 = vld [vmem:[%s2172_s13 + $0x218] sm:$0xff] }
  0xe9   : > { %v424_v59 = vld [vmem:[%s2172_s13 + $0x2d8] sm:$0xff] }
  0xef   : > { %494 = vmatmul.f32.gmra.mxu0 %v344_v60  ;;  %566 = vmatmul.f32.gmra.mxu1 %v368_v61 }
  0xf0   : > { %638 = vmatmul.f32.gmra.mxu2 %v392_v62  ;;  %710 = vmatmul.f32.gmra.mxu3 %v416_v63 }
  0xf7   : > { %497 = vmatmul.f32.gmra.mxu0 %v345_v0  ;;  %569 = vmatmul.f32.gmra.mxu1 %v369_v1  ;;  %v353_v0 = vld [vmem:[%s2172_s13 + $0xa0] sm:$0xff] }
  0xf8   : > { %641 = vmatmul.f32.gmra.mxu2 %v393_v2  ;;  %713 = vmatmul.f32.gmra.mxu3 %v417_v3  ;;  %v377_v1 = vld [vmem:[%s2172_s13 + $0x160] sm:$0xff] }
  0xff   : > { %500 = vmatmul.f32.gmra.mxu0 %v346_v4  ;;  %572 = vmatmul.f32.gmra.mxu1 %v370_v5  ;;  %v401_v5 = vld [vmem:[%s2172_s13 + $0x220] sm:$0xff] }
 0x100   : > { %644 = vmatmul.f32.gmra.mxu2 %v394_v6  ;;  %716 = vmatmul.f32.gmra.mxu3 %v418_v7  ;;  %v425_v6 = vld [vmem:[%s2172_s13 + $0x2e0] sm:$0xff] }
 0x107   : > { %503 = vmatmul.f32.gmra.mxu0 %v347_v8  ;;  %575 = vmatmul.f32.gmra.mxu1 %v371_v9 }
 0x108   : > { %647 = vmatmul.f32.gmra.mxu2 %v395_v10  ;;  %719 = vmatmul.f32.gmra.mxu3 %v419_v11  ;;  %v354_v11 = vld [vmem:[%s2172_s13 + $0xa8] sm:$0xff] }
 0x10f   : > { %506 = vmatmul.f32.gmra.mxu0 %v348_v12  ;;  %578 = vmatmul.f32.gmra.mxu1 %v372_v13  ;;  %v378_v12 = vld [vmem:[%s2172_s13 + $0x168] sm:$0xff] }
 0x110   : > { %650 = vmatmul.f32.gmra.mxu2 %v396_v14  ;;  %722 = vmatmul.f32.gmra.mxu3 %v420_v15 }
 0x114   : > { %v462_v18 = vpop.f32.mrf.mxu0  ;;  %v2276_v19 = vpop.f32.mrf.mxu1 }
 0x115   : > { %v752_v22 = vadd.f32 %v2274_v17, %v462_v18  ;;  %v402_v18 = vld [vmem:[%s2172_s13 + $0x228] sm:$0xff] }
 0x117   : > { %768 = vst [vmem:[%s2283_s8] sm:$0xff] %v752_v22  ;;  %509 = vmatmul.f32.gmra.mxu0 %v349_v20  ;;  %581 = vmatmul.f32.gmra.mxu1 %v373_v21  ;;  %v426_v20 = vld [vmem:[%s2172_s13 + $0x2e8] sm:$0xff] }
 0x118   : > { %653 = vmatmul.f32.gmra.mxu2 %v397_v23  ;;  %725 = vmatmul.f32.gmra.mxu3 %v421_v24 }
 0x11b   : > { %v606_v27 = vpop.f32.mrf.mxu2  ;;  %v678_v28 = vpop.f32.mrf.mxu3 }
 0x11c   : > { %v465_v29 = vpop.f32.mrf.mxu0  ;;  %v2293_v30 = vpop.f32.mrf.mxu1  ;;  %v1108_v33 = vadd.f32 %v2288_v25, %v606_v27  ;;  %v1150_v34 = vadd.f32 %v2291_v26, %v678_v28  ;;  %v355_v27 = vld [vmem:[%s2172_s13 + $0xb0] sm:$0xff] }
 0x11d   : > { %v753_v35 = vadd.f32 %v2274_v17, %v465_v29  ;;  %v379_v28 = vld [vmem:[%s2172_s13 + $0x170] sm:$0xff] }
 0x11e   : > { %1464 = vst [vmem:[%s2302_s5 + $0x100] sm:$0xff] %v1108_v33  ;;  %v403_v33 = vld [vmem:[%s2172_s13 + $0x230] sm:$0xff] }
 0x11f   : > { %769 = vst [vmem:[%s2283_s8 + $0x8] sm:$0xff] %v753_v35  ;;  %512 = vmatmul.f32.gmra.mxu0 %v350_v31  ;;  %584 = vmatmul.f32.gmra.mxu1 %v374_v32  ;;  %v2368_v35 = vperm.slane %v2270_v16, 1 }
 0x120   : > { %1488 = vst [vmem:[%s2302_s5 + $0x1c0] sm:$0xff] %v1150_v34  ;;  %656 = vmatmul.f32.gmra.mxu2 %v398_v36  ;;  %728 = vmatmul.f32.gmra.mxu3 %v422_v37  ;;  %v427_v34 = vld [vmem:[%s2172_s13 + $0x2f0] sm:$0xff] }
 0x123   : > { %v609_v38 = vpop.f32.mrf.mxu2  ;;  %v681_v39 = vpop.f32.mrf.mxu3 }
 0x124   : > { %v468_v40 = vpop.f32.mrf.mxu0  ;;  %v2307_v41 = vpop.f32.mrf.mxu1  ;;  %v1109_v44 = vadd.f32 %v2288_v25, %v609_v38  ;;  %v1151_v45 = vadd.f32 %v2291_v26, %v681_v39 }
 0x125   : > { %v754_v46 = vadd.f32 %v2274_v17, %v468_v40  ;;  %v356_v40 = vld [vmem:[%s2172_s13 + $0xb8] sm:$0xff] }
 0x126   : > { %1465 = vst [vmem:[%s2302_s5 + $0x108] sm:$0xff] %v1109_v44 }
 0x127   : > { %770 = vst [vmem:[%s2283_s8 + $0x10] sm:$0xff] %v754_v46  ;;  %515 = vmatmul.f32.gmra.mxu0 %v351_v42  ;;  %587 = vmatmul.f32.gmra.mxu1 %v375_v43  ;;  %v380_v42 = vld [vmem:[%s2172_s13 + $0x178] sm:$0xff] }
 0x128   : > { %1489 = vst [vmem:[%s2302_s5 + $0x1c8] sm:$0xff] %v1151_v45  ;;  %659 = vmatmul.f32.gmra.mxu2 %v399_v47  ;;  %731 = vmatmul.f32.gmra.mxu3 %v423_v48  ;;  %v404_v47 = vld [vmem:[%s2172_s13 + $0x238] sm:$0xff] }
 0x129   : > { %v428_v48 = vld [vmem:[%s2172_s13 + $0x2f8] sm:$0xff] }
 0x12b   : > { %v612_v49 = vpop.f32.mrf.mxu2  ;;  %v684_v50 = vpop.f32.mrf.mxu3 }
 0x12c   : > { %v471_v51 = vpop.f32.mrf.mxu0  ;;  %v2319_v52 = vpop.f32.mrf.mxu1  ;;  %v1110_v55 = vadd.f32 %v2288_v25, %v612_v49  ;;  %v1152_v56 = vadd.f32 %v2291_v26, %v684_v50 }
 0x12d   : > { %v755_v57 = vadd.f32 %v2274_v17, %v471_v51 }
 0x12e   : > { %1466 = vst [vmem:[%s2302_s5 + $0x110] sm:$0xff] %v1110_v55 }
 0x12f   : > { %771 = vst [vmem:[%s2283_s8 + $0x18] sm:$0xff] %v755_v57  ;;  %518 = vmatmul.f32.gmra.mxu0 %v352_v53  ;;  %590 = vmatmul.f32.gmra.mxu1 %v376_v54  ;;  %v2392_v57 = vperm.slane %v2270_v16, 5 }
 0x130   : > { %1490 = vst [vmem:[%s2302_s5 + $0x1d0] sm:$0xff] %v1152_v56  ;;  %662 = vmatmul.f32.gmra.mxu2 %v400_v58  ;;  %734 = vmatmul.f32.gmra.mxu3 %v424_v59 }
 0x133   : > { %v615_v60 = vpop.f32.mrf.mxu2  ;;  %v687_v61 = vpop.f32.mrf.mxu3 }
 0x134   : > { %v474_v62 = vpop.f32.mrf.mxu0  ;;  %v2331_v63 = vpop.f32.mrf.mxu1  ;;  %v1111_v2 = vadd.f32 %v2288_v25, %v615_v60  ;;  %v1153_v3 = vadd.f32 %v2291_v26, %v687_v61 }
 0x135   : > { %v756_v4 = vadd.f32 %v2274_v17, %v474_v62 }
 0x136   : > { %1467 = vst [vmem:[%s2302_s5 + $0x118] sm:$0xff] %v1111_v2 }
 0x137   : > { %772 = vst [vmem:[%s2283_s8 + $0x20] sm:$0xff] %v756_v4  ;;  %521 = vmatmul.f32.gmra.mxu0 %v353_v0  ;;  %593 = vmatmul.f32.gmra.mxu1 %v377_v1 }
 0x138   : > { %1491 = vst [vmem:[%s2302_s5 + $0x1d8] sm:$0xff] %v1153_v3  ;;  %665 = vmatmul.f32.gmra.mxu2 %v401_v5  ;;  %737 = vmatmul.f32.gmra.mxu3 %v425_v6 }
 0x13b   : > { %v618_v7 = vpop.f32.mrf.mxu2  ;;  %v690_v8 = vpop.f32.mrf.mxu3 }
 0x13c   : > { %v477_v9 = vpop.f32.mrf.mxu0  ;;  %v2343_v10 = vpop.f32.mrf.mxu1  ;;  %v1112_v13 = vadd.f32 %v2288_v25, %v618_v7  ;;  %v1154_v14 = vadd.f32 %v2291_v26, %v690_v8 }
 0x13d   : > { %v757_v15 = vadd.f32 %v2274_v17, %v477_v9 }
 0x13e   : > { %1468 = vst [vmem:[%s2302_s5 + $0x120] sm:$0xff] %v1112_v13 }
 0x13f   : > { %773 = vst [vmem:[%s2283_s8 + $0x28] sm:$0xff] %v757_v15  ;;  %524 = vmatmul.f32.gmra.mxu0 %v354_v11  ;;  %596 = vmatmul.f32.gmra.mxu1 %v378_v12 }
 0x140   : > { %1492 = vst [vmem:[%s2302_s5 + $0x1e0] sm:$0xff] %v1154_v14  ;;  %668 = vmatmul.f32.gmra.mxu2 %v402_v18  ;;  %740 = vmatmul.f32.gmra.mxu3 %v426_v20 }
 0x143   : > { %v621_v21 = vpop.f32.mrf.mxu2  ;;  %v693_v22 = vpop.f32.mrf.mxu3 }
 0x144   : > { %v480_v23 = vpop.f32.mrf.mxu0  ;;  %v2355_v24 = vpop.f32.mrf.mxu1  ;;  %v1113_v29 = vadd.f32 %v2288_v25, %v621_v21  ;;  %v1155_v31 = vadd.f32 %v2291_v26, %v693_v22 }
 0x145   : > { %v758_v32 = vadd.f32 %v2274_v17, %v480_v23 }
 0x146   : > { %1469 = vst [vmem:[%s2302_s5 + $0x128] sm:$0xff] %v1113_v29 }
 0x147   : > { %774 = vst [vmem:[%s2283_s8 + $0x30] sm:$0xff] %v758_v32  ;;  %527 = vmatmul.f32.gmra.mxu0 %v355_v27  ;;  %599 = vmatmul.f32.gmra.mxu1 %v379_v28 }
 0x148   : > { %1493 = vst [vmem:[%s2302_s5 + $0x1e8] sm:$0xff] %v1155_v31  ;;  %671 = vmatmul.f32.gmra.mxu2 %v403_v33  ;;  %743 = vmatmul.f32.gmra.mxu3 %v427_v34 }
 0x14b   : > { %v624_v36 = vpop.f32.mrf.mxu2  ;;  %v696_v37 = vpop.f32.mrf.mxu3 }
 0x14c   : > { %v483_v38 = vpop.f32.mrf.mxu0  ;;  %v555_v39 = vpop.f32.mrf.mxu1  ;;  %v1114_v43 = vadd.f32 %v2288_v25, %v624_v36  ;;  %v1156_v44 = vadd.f32 %v2291_v26, %v696_v37 }
 0x14d   : > { %v759_v45 = vadd.f32 %v2274_v17, %v483_v38  ;;  %v2376_v46 = vadd.f32 %v2368_v35, %v555_v39 }
 0x14e   : > { %1470 = vst [vmem:[%s2302_s5 + $0x130] sm:$0xff] %v1114_v43 }
 0x14f   : > { %775 = vst [vmem:[%s2283_s8 + $0x38] sm:$0xff] %v759_v45  ;;  %530 = vmatmul.f32.gmra.mxu0 %v356_v40  ;;  %602 = vmatmul.f32.gmra.mxu1 %v380_v42 }
 0x150   : > { %1494 = vst [vmem:[%s2302_s5 + $0x1f0] sm:$0xff] %v1156_v44  ;;  %674 = vmatmul.f32.gmra.mxu2 %v404_v47  ;;  %746 = vmatmul.f32.gmra.mxu3 %v428_v48 }
 0x153   : > { %v627_v49 = vpop.f32.mrf.mxu2  ;;  %v699_v50 = vpop.f32.mrf.mxu3 }
 0x154   : > { %v486_v51 = vpop.f32.mrf.mxu0  ;;  %v2383_v53 = vpop.f32.mrf.mxu1  ;;  %v1115_v54 = vadd.f32 %v2288_v25, %v627_v49  ;;  %v1157_v55 = vadd.f32 %v2291_v26, %v699_v50 }
 0x155   : > { %v760_v56 = vadd.f32 %v2274_v17, %v486_v51 }
 0x156   : > { %1471 = vst [vmem:[%s2302_s5 + $0x138] sm:$0xff] %v1115_v54 }
 0x157   : > { %776 = vst [vmem:[%s2283_s8 + $0x40] sm:$0xff] %v760_v56 }
 0x158   : > { %1495 = vst [vmem:[%s2302_s5 + $0x1f8] sm:$0xff] %v1157_v55 }
 0x15b   : > { %v630_v58 = vpop.f32.mrf.mxu2  ;;  %v702_v59 = vpop.f32.mrf.mxu3 }
 0x15c   : > { %v489_v60 = vpop.f32.mrf.mxu0  ;;  %v2394_v61 = vpop.f32.mrf.mxu1  ;;  %v1116_v62 = vadd.f32 %v2288_v25, %v630_v58  ;;  %v1176_v0 = vadd.f32 %v2392_v57, %v702_v59  ;;  %v2449_v58 = vperm.slane %v2270_v16, 2  ;;  %v2455_v59 = vadd.f32 %v2368_v35, %v2276_v19 }
 0x15d   : > { %v761_v1 = vadd.f32 %v2274_v17, %v489_v60 }
 0x15e   : > { %1472 = vst [vmem:[%s2302_s5 + $0x140] sm:$0xff] %v1116_v62  ;;  %v2459_v60 = vadd.f32 %v2449_v58, %v2383_v53  ;;  %v826_v19 = vmul.f32 %v2455_v59, %v2455_v59 }
 0x15f   : > { %777 = vst [vmem:[%s2283_s8 + $0x48] sm:$0xff] %v761_v1 }
 0x160   : > { %1496 = vst [vmem:[%s2302_s5 + $0x200] sm:$0xff] %v1176_v0  ;;  %v834_v53 = vmul.f32 %v2459_v60, %v2459_v60 }
 0x163   : > { %v633_v2 = vpop.f32.mrf.mxu2  ;;  %v705_v3 = vpop.f32.mrf.mxu3 }
 0x164   : > { %v492_v4 = vpop.f32.mrf.mxu0  ;;  %v2402_v5 = vpop.f32.mrf.mxu1  ;;  %v1117_v6 = vadd.f32 %v2288_v25, %v633_v2  ;;  %v1177_v7 = vadd.f32 %v2392_v57, %v705_v3 }
 0x165   : > { %v762_v8 = vadd.f32 %v2274_v17, %v492_v4 }
 0x166   : > { %1473 = vst [vmem:[%s2302_s5 + $0x148] sm:$0xff] %v1117_v6 }
 0x167   : > { %778 = vst [vmem:[%s2283_s8 + $0x50] sm:$0xff] %v762_v8 }
 0x168   : > { %1497 = vst [vmem:[%s2302_s5 + $0x208] sm:$0xff] %v1177_v7 }
 0x16b   : > { %v636_v9 = vpop.f32.mrf.mxu2  ;;  %v708_v11 = vpop.f32.mrf.mxu3 }
 0x16c   : > { %v495_v12 = vpop.f32.mrf.mxu0  ;;  %v2410_v13 = vpop.f32.mrf.mxu1  ;;  %v1118_v14 = vadd.f32 %v2288_v25, %v636_v9  ;;  %v1178_v15 = vadd.f32 %v2392_v57, %v708_v11  ;;  %v2481_v9 = vadd.f32 %v2449_v58, %v2394_v61 }
 0x16d   : > { %v763_v18 = vadd.f32 %v2274_v17, %v495_v12 }
 0x16e   : > { %1474 = vst [vmem:[%s2302_s5 + $0x150] sm:$0xff] %v1118_v14 }
 0x16f   : > { %779 = vst [vmem:[%s2283_s8 + $0x58] sm:$0xff] %v763_v18  ;;  %v2489_v18 = vadd.f32 %v2368_v35, %v2293_v30  ;;  %v835_v30 = vmul.f32 %v2481_v9, %v2481_v9 }
 0x170   : > { %1498 = vst [vmem:[%s2302_s5 + $0x210] sm:$0xff] %v1178_v15 }
 0x173   : > { %v639_v20 = vpop.f32.mrf.mxu2  ;;  %v711_v21 = vpop.f32.mrf.mxu3 }
 0x174   : > { %v498_v22 = vpop.f32.mrf.mxu0  ;;  %v2418_v23 = vpop.f32.mrf.mxu1  ;;  %v1119_v27 = vadd.f32 %v2288_v25, %v639_v20  ;;  %v1179_v28 = vadd.f32 %v2392_v57, %v711_v21 }
 0x175   : > { %v764_v29 = vadd.f32 %v2274_v17, %v498_v22 }
 0x176   : > { %1475 = vst [vmem:[%s2302_s5 + $0x158] sm:$0xff] %v1119_v27 }
 0x177   : > { %780 = vst [vmem:[%s2283_s8 + $0x60] sm:$0xff] %v764_v29 }
 0x178   : > { %1499 = vst [vmem:[%s2302_s5 + $0x218] sm:$0xff] %v1179_v28 }
 0x17b   : > { %v642_v31 = vpop.f32.mrf.mxu2  ;;  %v714_v32 = vpop.f32.mrf.mxu3 }
 0x17c   : > { %v501_v33 = vpop.f32.mrf.mxu0  ;;  %v2426_v34 = vpop.f32.mrf.mxu1  ;;  %v1120_v36 = vadd.f32 %v2288_v25, %v642_v31  ;;  %v1180_v37 = vadd.f32 %v2392_v57, %v714_v32  ;;  %v827_v31 = vmul.f32 %v2489_v18, %v2489_v18 }
 0x17d   : > { %v765_v38 = vadd.f32 %v2274_v17, %v501_v33  ;;  %v2513_v33 = vadd.f32 %v2368_v35, %v2307_v41  ;;  %v2527_v41 = vadd.f32 %v2449_v58, %v2402_v5 }
 0x17e   : > { %1476 = vst [vmem:[%s2302_s5 + $0x160] sm:$0xff] %v1120_v36 }
 0x17f   : > { %781 = vst [vmem:[%s2283_s8 + $0x68] sm:$0xff] %v765_v38 }
 0x180   : > { %1500 = vst [vmem:[%s2302_s5 + $0x220] sm:$0xff] %v1180_v37  ;;  %v2517_v37 = vadd.f32 %v2368_v35, %v2319_v52 }
 0x182   : > { %v2543_v5 = vmul.f32 %v2517_v37, %v2517_v37 }
 0x183   : > { %v645_v39 = vpop.f32.mrf.mxu2  ;;  %v717_v40 = vpop.f32.mrf.mxu3 }
 0x184   : > { %v504_v42 = vpop.f32.mrf.mxu0  ;;  %v2434_v43 = vpop.f32.mrf.mxu1  ;;  %v1121_v44 = vadd.f32 %v2288_v25, %v645_v39  ;;  %v1181_v45 = vadd.f32 %v2392_v57, %v717_v40  ;;  %v2521_v40 = vadd.f32 %v2368_v35, %v2331_v63  ;;  %v828_v63 = vmul.f32 %v2513_v33, %v2513_v33 }
 0x185   : > { %v766_v47 = vadd.f32 %v2274_v17, %v504_v42 }
 0x186   : > { %1477 = vst [vmem:[%s2302_s5 + $0x168] sm:$0xff] %v1121_v44 }
 0x187   : > { %782 = vst [vmem:[%s2283_s8 + $0x70] sm:$0xff] %v766_v47 }
 0x188   : > { %1501 = vst [vmem:[%s2302_s5 + $0x228] sm:$0xff] %v1181_v45 }
 0x18b   : > { %v648_v48 = vpop.f32.mrf.mxu2  ;;  %v720_v49 = vpop.f32.mrf.mxu3 }
 0x18c   : > { %v507_v50 = vpop.f32.mrf.mxu0  ;;  %v2442_v51 = vpop.f32.mrf.mxu1  ;;  %v1122_v54 = vadd.f32 %v2288_v25, %v648_v48  ;;  %v1182_v55 = vadd.f32 %v2392_v57, %v720_v49 }
 0x18d   : > { %v767_v56 = vadd.f32 %v2274_v17, %v507_v50 }
 0x18e   : > { %1478 = vst [vmem:[%s2302_s5 + $0x170] sm:$0xff] %v1122_v54 }
 0x18f   : > { %783 = vst [vmem:[%s2283_s8 + $0x78] sm:$0xff] %v767_v56 }
 0x190   : > { %1502 = vst [vmem:[%s2302_s5 + $0x230] sm:$0xff] %v1182_v55  ;;  %v2537_v55 = vadd.f32 %v2368_v35, %v2343_v10  ;;  %v2552_v10 = vadd.f32 %v2449_v58, %v2410_v13 }
 0x192   : > { %v2568_v13 = vmul.f32 %v2537_v55, %v2537_v55 }
 0x193   : > { %v651_v62 = vpop.f32.mrf.mxu2  ;;  %v723_v0 = vpop.f32.mrf.mxu3 }
 0x194   : > { %v510_v1 = vpop.f32.mrf.mxu0  ;;  %v582_v2 = vpop.f32.mrf.mxu1  ;;  %v1123_v17 = vadd.f32 %v2288_v25, %v651_v62  ;;  %v1183_v16 = vadd.f32 %v2392_v57, %v723_v0 }
 0x195   : > { %v2464_v3 = vadd.f32 %v2368_v35, %v510_v1  ;;  %v2467_v4 = vadd.f32 %v2449_v58, %v582_v2 }
 0x196   : > { %1479 = vst [vmem:[%s2302_s5 + $0x178] sm:$0xff] %v1123_v17 }
 0x197   : > { %v818_v6 = vmul.f32 %v2464_v3, %v2464_v3  ;;  %v842_v25 = vmul.f32 %v2467_v4, %v2467_v4  ;;  %1503 = vst [vmem:[%s2302_s5 + $0x238] sm:$0xff] %v1183_v16  ;;  %v2560_v16 = vmul.f32 %v2521_v40, %v2521_v40 }
 0x199   : > { %v850_v7 = vadd.f32 %v834_v53, %v818_v6  ;;  %v858_v8 = vadd.f32 %v842_v25, %v826_v19  ;;  %v836_v19 = vmul.f32 %v2527_v41, %v2527_v41  ;;  %v2572_v25 = vadd.f32 %v2368_v35, %v2355_v24 }
 0x19b   : > { %v2483_v11 = vmax.f32 %v850_v7, 1e-24  ;;  %v2485_v12 = vmax.f32 %v858_v8, 1e-24  ;;  %v654_v14 = vpop.f32.mrf.mxu2  ;;  %v726_v15 = vpop.f32.mrf.mxu3 }
 0x19c   : > { %v513_v20 = vpop.f32.mrf.mxu0  ;;  %v585_v21 = vpop.f32.mrf.mxu1  ;;  %v1142_v22 = vadd.f32 %v2291_v26, %v654_v14  ;;  %v1184_v27 = vadd.f32 %v2392_v57, %v726_v15  ;;  %v2579_v14 = vadd.f32 %v2449_v58, %v2418_v23 }
 0x19d   : > { %1719 = vrsqrt.f32 %v2483_v11  ;;  %v2495_v61 = vadd.f32 %v2368_v35, %v513_v20  ;;  %v2499_v28 = vadd.f32 %v2449_v58, %v585_v21  ;;  %vm888_vm2 = vweird.f32 %v2483_v11 }
 0x19e   : > { %1721 = vrsqrt.f32 %v2485_v12  ;;  %1480 = vst [vmem:[%s2302_s5 + $0x180] sm:$0xff] %v1142_v22  ;;  %v837_v22 = vmul.f32 %v2552_v10, %v2552_v10  ;;  %vm968_vm4 = vweird.f32 %v2485_v12 }
 0x19f   : > { %v819_v29 = vmul.f32 %v2495_v61, %v2495_v61  ;;  %1504 = vst [vmem:[%s2302_s5 + $0x240] sm:$0xff] %v1184_v27  ;;  %v843_v32 = vmul.f32 %v2499_v28, %v2499_v28 }
 0x1a1   : > { %v851_v36 = vadd.f32 %v835_v30, %v819_v29  ;;  %v859_v38 = vadd.f32 %v843_v32, %v827_v31 }
 0x1a3   : > { %v1720_v39 = vpop.eup %1719  ;;  %v2523_v42 = vmax.f32 %v851_v36, 1e-24  ;;  %v657_v44 = vpop.f32.mrf.mxu2  ;;  %v2530_v52 = vmax.f32 %v859_v38, 1e-24 }
 0x1a4   : > { %v729_v45 = vpop.f32.mrf.mxu3  ;;  %v1722_v47 = vpop.eup %1721  ;;  %v883_v48 = vmul.f32 %v1720_v39, %v2483_v11  ;;  %v1143_v54 = vadd.f32 %v2291_v26, %v657_v44  ;;  %vm889_vm0 = vweird.f32 %v1720_v39  ;;  %v2600_v11 = vmul.f32 %v2579_v14, %v2579_v14 }
 0x1a5   : > { %v516_v49 = vpop.f32.mrf.mxu0  ;;  %v588_v50 = vpop.f32.mrf.mxu1  ;;  %v963_v56 = vmul.f32 %v1722_v47, %v2485_v12  ;;  %1723 = vrsqrt.f32 %v2523_v42  ;;  %v1185_v17 = vadd.f32 %v2392_v57, %v729_v45  ;;  %vm969_vm1 = vweird.f32 %v1722_v47  ;;  %vm890_vm3 = vmor %vm888_vm2, %vm889_vm0 }
 0x1a6   : > { %v884_v62 = vmul.f32 %v1720_v39, %v883_v48  ;;  %1725 = vrsqrt.f32 %v2530_v52  ;;  %v2547_v0 = vadd.f32 %v2368_v35, %v516_v49  ;;  %1481 = vst [vmem:[%s2302_s5 + $0x188] sm:$0xff] %v1143_v54  ;;  %v2555_v2 = vadd.f32 %v2449_v58, %v588_v50  ;;  %vm970_vm5 = vmor %vm968_vm4, %vm969_vm1 }
 0x1a7   : > { %v964_v1 = vmul.f32 %v1722_v47, %v963_v56  ;;  %1505 = vst [vmem:[%s2302_s5 + $0x248] sm:$0xff] %v1185_v17  ;;  %vm898_vm8 = vweird.f32 %v2523_v42  ;;  %vm978_vm10 = vweird.f32 %v2530_v52 }
 0x1a8   : > { %v885_v53 = vmul.f32 0.5, %v884_v62  ;;  %v820_v6 = vmul.f32 %v2547_v0, %v2547_v0  ;;  %v844_v8 = vmul.f32 %v2555_v2, %v2555_v2 }
 0x1a9   : > { %v965_v7 = vmul.f32 0.5, %v964_v1 }
 0x1aa   : > { %v886_v15 = vsub.f32 1.5, %v885_v53  ;;  %v852_v20 = vadd.f32 %v836_v19, %v820_v6  ;;  %v860_v24 = vadd.f32 %v844_v8, %v828_v63  ;;  %v2613_v19 = vadd.f32 %v2449_v58, %v2426_v34 }
 0x1ab   : > { %v2581_v21 = vpop.eup %1723  ;;  %v966_v27 = vsub.f32 1.5, %v965_v7  ;;  %v660_v30 = vpop.f32.mrf.mxu2 }
 0x1ac   : > { %v732_v29 = vpop.f32.mrf.mxu3  ;;  %v2585_v31 = vpop.eup %1725  ;;  %v887_v32 = vmul.f32 %v1720_v39, %v886_v15  ;;  %v893_v23 = vmul.f32 %v2581_v21, %v2523_v42  ;;  %v2590_v36 = vmax.f32 %v852_v20, 1e-24  ;;  %v2596_v49 = vmax.f32 %v860_v24, 1e-24 }
 0x1ad   : > { %v519_v38 = vpop.f32.mrf.mxu0  ;;  %v591_v44 = vpop.f32.mrf.mxu1  ;;  %v967_v45 = vmul.f32 %v1722_v47, %v966_v27  ;;  %v973_v48 = vmul.f32 %v2585_v31, %v2530_v52  ;;  %vm899_vm6 = vweird.f32 %v2581_v21  ;;  %vm979_vm7 = vweird.f32 %v2585_v31 }
 0x1ae   : > { %v891_v50 = vsel %vm890_vm3, %v1720_v39, %v887_v32  ;;  %v894_v54 = vmul.f32 %v2581_v21, %v893_v23  ;;  %1727 = vrsqrt.f32 %v2590_v36  ;;  %vm900_vm9 = vmor %vm898_vm8, %vm899_vm6  ;;  %vm908_vm12 = vweird.f32 %v2590_v36 }
 0x1af   : > { %v1042_v12 = vmul.f32 %v891_v50, %v2464_v3  ;;  %v1074_v63 = vmul.f32 %v891_v50, %v2459_v60  ;;  %v971_v56 = vsel %vm970_vm5, %v1722_v47, %v967_v45  ;;  %v974_v62 = vmul.f32 %v2585_v31, %v973_v48  ;;  %vm980_vm11 = vmor %vm978_vm10, %vm979_vm7 }
 0x1b0   : > { %v1050_v1 = vmul.f32 %v971_v56, %v2455_v59  ;;  %v1082_v17 = vmul.f32 %v971_v56, %v2467_v4  ;;  %v895_v39 = vmul.f32 0.5, %v894_v54  ;;  %1729 = vrsqrt.f32 %v2596_v49 }
 0x1b1   : > { %1058 = vst [vmem:[%s2302_s5] sm:$0xff] %v1042_v12  ;;  %v975_v53 = vmul.f32 0.5, %v974_v62  ;;  %v2617_v60 = vadd.f32 %v2368_v35, %v519_v38  ;;  %v2620_v3 = vadd.f32 %v2449_v58, %v591_v44  ;;  %v1144_v4 = vadd.f32 %v2291_v26, %v660_v30 }
 0x1b2   : > { %1448 = vst [vmem:[%s2302_s5 + $0x80] sm:$0xff] %v1074_v63  ;;  %v896_v59 = vsub.f32 1.5, %v895_v39  ;;  %v1186_v47 = vadd.f32 %v2392_v57, %v732_v29  ;;  %vm988_vm0 = vweird.f32 %v2596_v49 }
 0x1b3   : > { %1066 = vst [vmem:[%s2302_s5 + $0x40] sm:$0xff] %v1050_v1  ;;  %v976_v34 = vsub.f32 1.5, %v975_v53  ;;  %v821_v6 = vmul.f32 %v2617_v60, %v2617_v60  ;;  %v845_v7 = vmul.f32 %v2620_v3, %v2620_v3  ;;  %v663_v8 = vpop.f32.mrf.mxu2 }
 0x1b4   : > { %v735_v15 = vpop.f32.mrf.mxu3  ;;  %v2632_v20 = vpop.eup %1727  ;;  %1456 = vst [vmem:[%s2302_s5 + $0xc0] sm:$0xff] %v1082_v17  ;;  %v897_v27 = vmul.f32 %v2581_v21, %v896_v59  ;;  %v1145_v29 = vadd.f32 %v2291_v26, %v663_v8  ;;  %v2680_v17 = vadd.f32 %v2449_v58, %v2434_v43 }
 0x1b5   : > { %v522_v24 = vpop.f32.mrf.mxu0  ;;  %v594_v30 = vpop.f32.mrf.mxu1  ;;  %v1187_v32 = vadd.f32 %v2392_v57, %v735_v15  ;;  %v977_v23 = vmul.f32 %v2585_v31, %v976_v34  ;;  %v903_v38 = vmul.f32 %v2632_v20, %v2590_v36  ;;  %v853_v44 = vadd.f32 %v837_v22, %v821_v6  ;;  %1482 = vst [vmem:[%s2302_s5 + $0x190] sm:$0xff] %v1144_v4 }
 0x1b6   : > { %v2646_v42 = vpop.eup %1729  ;;  %v901_v45 = vsel %vm900_vm9, %v2581_v21, %v897_v27  ;;  %v861_v48 = vadd.f32 %v845_v7, %v2543_v5  ;;  %v2653_v50 = vadd.f32 %v2368_v35, %v522_v24  ;;  %v2656_v52 = vadd.f32 %v2449_v58, %v594_v30  ;;  %1506 = vst [vmem:[%s2302_s5 + $0x250] sm:$0xff] %v1186_v47 }
 0x1b7   : > { %v1043_v22 = vmul.f32 %v901_v45, %v2495_v61  ;;  %v1075_v54 = vmul.f32 %v901_v45, %v2481_v9  ;;  %v981_v21 = vsel %vm980_vm11, %v2585_v31, %v977_v23  ;;  %v904_v12 = vmul.f32 %v2632_v20, %v903_v38  ;;  %1483 = vst [vmem:[%s2302_s5 + $0x198] sm:$0xff] %v1145_v29 }
 0x1b8   : > { %v839_v5 = vmul.f32 %v2613_v19, %v2613_v19  ;;  %v1051_v63 = vmul.f32 %v981_v21, %v2489_v18  ;;  %v1083_v56 = vmul.f32 %v981_v21, %v2499_v28  ;;  %v983_v62 = vmul.f32 %v2646_v42, %v2596_v49  ;;  %1507 = vst [vmem:[%s2302_s5 + $0x258] sm:$0xff] %v1187_v32 }
 0x1b9   : > { %1059 = vst [vmem:[%s2302_s5 + $0x8] sm:$0xff] %v1043_v22  ;;  %v905_v61 = vmul.f32 0.5, %v904_v12  ;;  %v2672_v9 = vmax.f32 %v853_v44, 1e-24  ;;  %v2674_v31 = vmax.f32 %v861_v48, 1e-24  ;;  %v822_v1 = vmul.f32 %v2653_v50, %v2653_v50 }
 0x1ba   : > { %1449 = vst [vmem:[%s2302_s5 + $0x88] sm:$0xff] %v1075_v54  ;;  %v984_v18 = vmul.f32 %v2646_v42, %v983_v62  ;;  %v846_v28 = vmul.f32 %v2656_v52, %v2656_v52  ;;  %vm909_vm13 = vweird.f32 %v2632_v20  ;;  %vm989_vm14 = vweird.f32 %v2646_v42 }
 0x1bb   : > { %1067 = vst [vmem:[%s2302_s5 + $0x48] sm:$0xff] %v1051_v63  ;;  %v906_v39 = vsub.f32 1.5, %v905_v61  ;;  %1731 = vrsqrt.f32 %v2672_v9  ;;  %v666_v53 = vpop.f32.mrf.mxu2  ;;  %v854_v4 = vadd.f32 %v2600_v11, %v822_v1  ;;  %vm910_vm15 = vmor %vm908_vm12, %vm909_vm13  ;;  %v832_v49 = vmul.f32 %v2572_v25, %v2572_v25 }
 0x1bc   : > { %v738_v59 = vpop.f32.mrf.mxu3  ;;  %1457 = vst [vmem:[%s2302_s5 + $0xc8] sm:$0xff] %v1083_v56  ;;  %v985_v43 = vmul.f32 0.5, %v984_v18  ;;  %1733 = vrsqrt.f32 %v2674_v31  ;;  %v862_v47 = vadd.f32 %v846_v28, %v2560_v16  ;;  %v1146_v27 = vadd.f32 %v2291_v26, %v666_v53  ;;  %vm990_vm1 = vmor %vm988_vm0, %vm989_vm14 }
 0x1bd   : > { %v525_v34 = vpop.f32.mrf.mxu0  ;;  %v597_v6 = vpop.f32.mrf.mxu1  ;;  %v907_v7 = vmul.f32 %v2632_v20, %v906_v39  ;;  %v2707_v11 = vmax.f32 %v854_v4, 1e-24  ;;  %v1188_v30 = vadd.f32 %v2392_v57, %v738_v59  ;;  %v2730_v45 = vmul.f32 %v2376_v46, %v2376_v46 }
 0x1be   : > { %v2697_v8 = vadd.f32 %v2368_v35, %v525_v34  ;;  %v2700_v15 = vadd.f32 %v2449_v58, %v597_v6  ;;  %v986_v16 = vsub.f32 1.5, %v985_v43  ;;  %v2709_v24 = vmax.f32 %v862_v47, 1e-24  ;;  %1484 = vst [vmem:[%s2302_s5 + $0x1a0] sm:$0xff] %v1146_v27 }
 0x1bf   : > { %v911_v29 = vsel %vm910_vm15, %v2632_v20, %v907_v7  ;;  %1735 = vrsqrt.f32 %v2707_v11  ;;  %1508 = vst [vmem:[%s2302_s5 + $0x260] sm:$0xff] %v1188_v30  ;;  %v2739_v48 = vadd.f32 %v2449_v58, %v2442_v51  ;;  %v840_v12 = vmul.f32 %v2680_v17, %v2680_v17 }
 0x1c0   : > { %v823_v32 = vmul.f32 %v2697_v8, %v2697_v8  ;;  %v847_v23 = vmul.f32 %v2700_v15, %v2700_v15  ;;  %v1044_v36 = vmul.f32 %v911_v29, %v2547_v0  ;;  %v1076_v38 = vmul.f32 %v911_v29, %v2527_v41 }
 0x1c1   : > { %v987_v44 = vmul.f32 %v2646_v42, %v986_v16  ;;  %v2724_v20 = vpop.eup %1731  ;;  %1737 = vrsqrt.f32 %v2709_v24  ;;  %v2770_v43 = vmul.f32 %v2739_v48, %v2739_v48  ;;  %vm918_vm2 = vweird.f32 %v2672_v9 }
 0x1c2   : > { %v855_v41 = vadd.f32 %v839_v5, %v823_v32  ;;  %v2735_v0 = vpop.eup %1733  ;;  %1060 = vst [vmem:[%s2302_s5 + $0x10] sm:$0xff] %v1044_v36  ;;  %v913_v54 = vmul.f32 %v2724_v20, %v2672_v9  ;;  %v863_v21 = vadd.f32 %v847_v23, %v2568_v13  ;;  %vm998_vm3 = vweird.f32 %v2674_v31 }
 0x1c3   : > { %v991_v22 = vsel %vm990_vm1, %v2646_v42, %v987_v44  ;;  %1450 = vst [vmem:[%s2302_s5 + $0x90] sm:$0xff] %v1076_v38  ;;  %v993_v51 = vmul.f32 %v2735_v0, %v2674_v31  ;;  %v669_v56 = vpop.f32.mrf.mxu2  ;;  %vm919_vm4 = vweird.f32 %v2724_v20  ;;  %vm999_vm5 = vweird.f32 %v2735_v0 }
 0x1c4   : > { %v1052_v5 = vmul.f32 %v991_v22, %v2513_v33  ;;  %v1084_v63 = vmul.f32 %v991_v22, %v2555_v2  ;;  %v741_v42 = vpop.f32.mrf.mxu3  ;;  %v914_v62 = vmul.f32 %v2724_v20, %v913_v54  ;;  %v2754_v61 = vmax.f32 %v855_v41, 1e-24  ;;  %vm920_vm7 = vmor %vm918_vm2, %vm919_vm4 }
 0x1c5   : > { %v2756_v1 = vmax.f32 %v863_v21, 1e-24  ;;  %v528_v13 = vpop.f32.mrf.mxu0  ;;  %v600_v18 = vpop.f32.mrf.mxu1  ;;  %v1147_v28 = vadd.f32 %v2291_v26, %v669_v56  ;;  %v994_v33 = vmul.f32 %v2735_v0, %v993_v51  ;;  %v1189_v53 = vadd.f32 %v2392_v57, %v741_v42  ;;  %vm1000_vm9 = vmor %vm998_vm3, %vm999_vm5 }
 0x1c6   : > { %1068 = vst [vmem:[%s2302_s5 + $0x50] sm:$0xff] %v1052_v5  ;;  %v2762_v2 = vadd.f32 %v2368_v35, %v528_v13  ;;  %v2765_v39 = vadd.f32 %v2449_v58, %v600_v18  ;;  %v1736_v59 = vpop.eup %1735  ;;  %v915_v4 = vmul.f32 0.5, %v914_v62  ;;  %1739 = vrsqrt.f32 %v2754_v61 }
 0x1c7   : > { %1458 = vst [vmem:[%s2302_s5 + $0xd0] sm:$0xff] %v1084_v63  ;;  %v2775_v47 = vpop.eup %1737  ;;  %v995_v34 = vmul.f32 0.5, %v994_v33  ;;  %v923_v6 = vmul.f32 %v1736_v59, %v2707_v11  ;;  %1741 = vrsqrt.f32 %v2756_v1  ;;  %vm929_vm6 = vweird.f32 %v1736_v59 }
 0x1c8   : > { %1485 = vst [vmem:[%s2302_s5 + $0x1a8] sm:$0xff] %v1147_v28  ;;  %v916_v7 = vsub.f32 1.5, %v915_v4  ;;  %v1003_v27 = vmul.f32 %v2775_v47, %v2709_v24  ;;  %v824_v16 = vmul.f32 %v2762_v2, %v2762_v2  ;;  %v848_v32 = vmul.f32 %v2765_v39, %v2765_v39 }
 0x1c9   : > { %1509 = vst [vmem:[%s2302_s5 + $0x268] sm:$0xff] %v1189_v53  ;;  %v996_v30 = vsub.f32 1.5, %v995_v34  ;;  %v924_v29 = vmul.f32 %v1736_v59, %v923_v6  ;;  %vm1009_vm8 = vweird.f32 %v2775_v47  ;;  %vm928_vm10 = vweird.f32 %v2707_v11 }
 0x1ca   : > { %v917_v23 = vmul.f32 %v2724_v20, %v916_v7  ;;  %v1004_v36 = vmul.f32 %v2775_v47, %v1003_v27  ;;  %v856_v38 = vadd.f32 %v840_v12, %v824_v16  ;;  %v864_v22 = vadd.f32 %v848_v32, %v832_v49  ;;  %vm930_vm12 = vmor %vm928_vm10, %vm929_vm6 }
 0x1cb   : > { %v997_v44 = vmul.f32 %v2735_v0, %v996_v30  ;;  %v925_v41 = vmul.f32 0.5, %v924_v29  ;;  %v672_v54 = vpop.f32.mrf.mxu2  ;;  %vm1008_vm11 = vweird.f32 %v2709_v24  ;;  %vm938_vm13 = vweird.f32 %v2754_v61 }
 0x1cc   : > { %v744_v21 = vpop.f32.mrf.mxu3  ;;  %v2796_v5 = vpop.eup %1739  ;;  %v921_v63 = vsel %vm920_vm7, %v2724_v20, %v917_v23  ;;  %v1005_v9 = vmul.f32 0.5, %v1004_v36  ;;  %v2803_v12 = vmax.f32 %v856_v38, 1e-24  ;;  %v1148_v51 = vadd.f32 %v2291_v26, %v672_v54  ;;  %vm1010_vm14 = vmor %vm1008_vm11, %vm1009_vm8 }
 0x1cd   : > { %v2806_v56 = vpop.eup %1741  ;;  %v1045_v49 = vmul.f32 %v921_v63, %v2617_v60  ;;  %v1077_v42 = vmul.f32 %v921_v63, %v2552_v10  ;;  %v1001_v20 = vsel %vm1000_vm9, %v2735_v0, %v997_v44  ;;  %v926_v62 = vsub.f32 1.5, %v925_v41  ;;  %v531_v33 = vpop.f32.mrf.mxu0 }
 0x1ce   : > { %v1053_v13 = vmul.f32 %v1001_v20, %v2517_v37  ;;  %v1085_v31 = vmul.f32 %v1001_v20, %v2620_v3  ;;  %v1006_v18 = vsub.f32 1.5, %v1005_v9  ;;  %v933_v28 = vmul.f32 %v2796_v5, %v2754_v61  ;;  %1486 = vst [vmem:[%s2302_s5 + $0x1b0] sm:$0xff] %v1148_v51  ;;  %v603_v4 = vpop.f32.mrf.mxu1 }
 0x1cf   : > { %1061 = vst [vmem:[%s2302_s5 + $0x18] sm:$0xff] %v1045_v49  ;;  %v927_v53 = vmul.f32 %v1736_v59, %v926_v62  ;;  %v1013_v10 = vmul.f32 %v2806_v56, %v2756_v1  ;;  %1743 = vrsqrt.f32 %v2803_v12  ;;  %v2831_v24 = vmax.f32 %v864_v22, 1e-24 }
 0x1d0   : > { %1451 = vst [vmem:[%s2302_s5 + $0x98] sm:$0xff] %v1077_v42  ;;  %v1007_v37 = vmul.f32 %v2775_v47, %v1006_v18  ;;  %v934_v60 = vmul.f32 %v2796_v5, %v933_v28  ;;  %v2834_v0 = vadd.f32 %v2368_v35, %v531_v33  ;;  %vm939_vm15 = vweird.f32 %v2796_v5 }
 0x1d1   : > { %1069 = vst [vmem:[%s2302_s5 + $0x58] sm:$0xff] %v1053_v13  ;;  %v931_v3 = vsel %vm930_vm12, %v1736_v59, %v927_v53  ;;  %v1014_v11 = vmul.f32 %v2806_v56, %v1013_v10  ;;  %1745 = vrsqrt.f32 %v2831_v24  ;;  %vm1019_vm0 = vweird.f32 %v2806_v56  ;;  %vm940_vm1 = vmor %vm938_vm13, %vm939_vm15 }
 0x1d2   : > { %1459 = vst [vmem:[%s2302_s5 + $0xd8] sm:$0xff] %v1085_v31  ;;  %v1046_v34 = vmul.f32 %v931_v3, %v2653_v50  ;;  %v1078_v6 = vmul.f32 %v931_v3, %v2579_v14  ;;  %v1011_v59 = vsel %vm1010_vm14, %v2775_v47, %v1007_v37  ;;  %v935_v7 = vmul.f32 0.5, %v934_v60 }
 0x1d3   : > { %v1054_v27 = vmul.f32 %v1011_v59, %v2521_v40  ;;  %v1086_v16 = vmul.f32 %v1011_v59, %v2656_v52  ;;  %v1015_v30 = vmul.f32 0.5, %v1014_v11  ;;  %v675_v35 = vpop.f32.mrf.mxu2  ;;  %v825_v14 = vmul.f32 %v2834_v0, %v2834_v0 }
 0x1d4   : > { %v747_v29 = vpop.f32.mrf.mxu3  ;;  %1062 = vst [vmem:[%s2302_s5 + $0x20] sm:$0xff] %v1046_v34  ;;  %v936_v32 = vsub.f32 1.5, %v935_v7  ;;  %v2848_v50 = vadd.f32 %v2449_v58, %v603_v4  ;;  %v1190_v52 = vadd.f32 %v2392_v57, %v744_v21  ;;  %v1149_v47 = vadd.f32 %v2291_v26, %v675_v35 }
 0x1d5   : > { %1452 = vst [vmem:[%s2302_s5 + $0xa0] sm:$0xff] %v1078_v6  ;;  %v1016_v40 = vsub.f32 1.5, %v1015_v30  ;;  %v1744_v23 = vpop.eup %1743  ;;  %v857_v38 = vadd.f32 %v2770_v43, %v825_v14  ;;  %v1191_v58 = vadd.f32 %v2392_v57, %v747_v29  ;;  %vm1018_vm2 = vweird.f32 %v2756_v1 }
 0x1d6   : > { %1070 = vst [vmem:[%s2302_s5 + $0x60] sm:$0xff] %v1054_v27  ;;  %v937_v36 = vmul.f32 %v2796_v5, %v936_v32  ;;  %v849_v44 = vmul.f32 %v2848_v50, %v2848_v50  ;;  %v943_v41 = vmul.f32 %v1744_v23, %v2803_v12  ;;  %vm1020_vm3 = vmor %vm1018_vm2, %vm1019_vm0  ;;  %vm949_vm4 = vweird.f32 %v1744_v23 }
 0x1d7   : > { %1460 = vst [vmem:[%s2302_s5 + $0xe0] sm:$0xff] %v1086_v16  ;;  %v1017_v26 = vmul.f32 %v2806_v56, %v1016_v40  ;;  %v873_v57 = vmax.f32 %v857_v38, 1e-24  ;;  %v1746_v61 = vpop.eup %1745  ;;  %vm948_vm5 = vweird.f32 %v2803_v12  ;;  %vm1028_vm8 = vweird.f32 %v2831_v24 }
 0x1d8   : > { %v941_v43 = vsel %vm940_vm1, %v2796_v5, %v937_v36  ;;  %v865_v22 = vadd.f32 %v849_v44, %v2730_v45  ;;  %1510 = vst [vmem:[%s2302_s5 + $0x270] sm:$0xff] %v1190_v52  ;;  %v944_v63 = vmul.f32 %v1744_v23, %v943_v41  ;;  %v1023_v51 = vmul.f32 %v1746_v61, %v2831_v24  ;;  %vm950_vm6 = vmor %vm948_vm5, %vm949_vm4 }
 0x1d9   : > { %v1047_v54 = vmul.f32 %v941_v43, %v2697_v8  ;;  %v1079_v1 = vmul.f32 %v941_v43, %v2613_v19  ;;  %v1021_v21 = vsel %vm1020_vm3, %v2806_v56, %v1017_v26  ;;  %1487 = vst [vmem:[%s2302_s5 + $0x1b8] sm:$0xff] %v1149_v47  ;;  %1747 = vrsqrt.f32 %v873_v57 }
 0x1da   : > { %v1055_v5 = vmul.f32 %v1021_v21, %v2537_v55  ;;  %v1087_v9 = vmul.f32 %v1021_v21, %v2700_v15  ;;  %1511 = vst [vmem:[%s2302_s5 + $0x278] sm:$0xff] %v1191_v58  ;;  %v945_v45 = vmul.f32 0.5, %v944_v63  ;;  %v881_v49 = vmax.f32 %v865_v22, 1e-24 }
 0x1db   : > { %1063 = vst [vmem:[%s2302_s5 + $0x28] sm:$0xff] %v1047_v54  ;;  %v1024_v8 = vmul.f32 %v1746_v61, %v1023_v51  ;;  %vm1029_vm7 = vweird.f32 %v1746_v61  ;;  %vm958_vm11 = vweird.f32 %v873_v57 }
 0x1dc   : > { %1453 = vst [vmem:[%s2302_s5 + $0xa8] sm:$0xff] %v1079_v1  ;;  %v946_v19 = vsub.f32 1.5, %v945_v45  ;;  %1749 = vrsqrt.f32 %v881_v49  ;;  %vm1030_vm9 = vmor %vm1028_vm8, %vm1029_vm7  ;;  %vm1038_vm14 = vweird.f32 %v881_v49 }
 0x1dd   : > { %1071 = vst [vmem:[%s2302_s5 + $0x68] sm:$0xff] %v1055_v5  ;;  %v1025_v56 = vmul.f32 0.5, %v1024_v8 }
 0x1de   : > { %1461 = vst [vmem:[%s2302_s5 + $0xe8] sm:$0xff] %v1087_v9  ;;  %v947_v42 = vmul.f32 %v1744_v23, %v946_v19 }
 0x1df   : > { %v1026_v55 = vsub.f32 1.5, %v1025_v56  ;;  %v1748_v15 = vpop.eup %1747 }
 0x1e0   : > { %v951_v20 = vsel %vm950_vm6, %v1744_v23, %v947_v42  ;;  %v953_v18 = vmul.f32 %v1748_v15, %v873_v57  ;;  %vm959_vm10 = vweird.f32 %v1748_v15 }
 0x1e1   : > { %v1048_v62 = vmul.f32 %v951_v20, %v2762_v2  ;;  %v1080_v13 = vmul.f32 %v951_v20, %v2680_v17  ;;  %v1027_v31 = vmul.f32 %v1746_v61, %v1026_v55  ;;  %vm960_vm13 = vmor %vm958_vm11, %vm959_vm10 }
 0x1e2   : > { %v1750_v28 = vpop.eup %1749  ;;  %v954_v33 = vmul.f32 %v1748_v15, %v953_v18 }
 0x1e3   : > { %1064 = vst [vmem:[%s2302_s5 + $0x30] sm:$0xff] %v1048_v62  ;;  %v1031_v12 = vsel %vm1030_vm9, %v1746_v61, %v1027_v31  ;;  %v1033_v53 = vmul.f32 %v1750_v28, %v881_v49  ;;  %vm1039_vm12 = vweird.f32 %v1750_v28 }
 0x1e4   : > { %1454 = vst [vmem:[%s2302_s5 + $0xb0] sm:$0xff] %v1080_v13  ;;  %v1056_v10 = vmul.f32 %v1031_v12, %v2572_v25  ;;  %v1088_v37 = vmul.f32 %v1031_v12, %v2765_v39  ;;  %v955_v60 = vmul.f32 0.5, %v954_v33  ;;  %vm1040_vm15 = vmor %vm1038_vm14, %vm1039_vm12 }
 0x1e5   : > { %v1034_v3 = vmul.f32 %v1750_v28, %v1033_v53 }
 0x1e6   : > { %1072 = vst [vmem:[%s2302_s5 + $0x70] sm:$0xff] %v1056_v10  ;;  %v956_v2 = vsub.f32 1.5, %v955_v60 }
 0x1e7   : > { %1462 = vst [vmem:[%s2302_s5 + $0xf0] sm:$0xff] %v1088_v37  ;;  %v1035_v17 = vmul.f32 0.5, %v1034_v3 }
 0x1e8   : > { %v957_v11 = vmul.f32 %v1748_v15, %v956_v2 }
 0x1e9   : > { %v1036_v24 = vsub.f32 1.5, %v1035_v17 }
 0x1ea   : > { %v961_v25 = vsel %vm960_vm13, %v1748_v15, %v957_v11 }
 0x1eb   : > { %v1037_v39 = vmul.f32 %v1750_v28, %v1036_v24  ;;  %v1049_v4 = vmul.f32 %v961_v25, %v2834_v0  ;;  %v1081_v34 = vmul.f32 %v961_v25, %v2739_v48 }
 0x1ed   : > { %v1041_v6 = vsel %vm1040_vm15, %v1750_v28, %v1037_v39  ;;  %1065 = vst [vmem:[%s2302_s5 + $0x38] sm:$0xff] %v1049_v4 }
 0x1ee   : > { %v1057_v59 = vmul.f32 %v1041_v6, %v2376_v46  ;;  %v1089_v7 = vmul.f32 %v1041_v6, %v2848_v50  ;;  %1455 = vst [vmem:[%s2302_s5 + $0xb8] sm:$0xff] %v1081_v34 }
 0x1f0   : > { %1073 = vst [vmem:[%s2302_s5 + $0x78] sm:$0xff] %v1057_v59 }
 0x1f1   : > { %1463 = vst [vmem:[%s2302_s5 + $0xf8] sm:$0xff] %v1089_v7 }
 0x1f2   : > { %s3019_s29 = sld [smem:[#allocation23_spill]]  ;;  %s1513_s2 = sshll.u32 %s1927_s21, 4 }
 0x1f3   : > { %s1239_s23 = sshll.u32 %s2302_s5, 4  ;;  %s1954_s20 = smov 2048   ;;  %s1240_s23 = int_to_ptr.vmem [resolvable:$true] %s1239_s23 }
 0x1f4   : > { %1589 = sst [smem:[#allocation14]] (%p2111_p7), %s1954_s20  ;;  %s1955_s3 = smov 4096  }
 0x1f5   : > { %s3021_s13 = sld [smem:[#allocation32_spill]]  ;;  %s1956_s21 = smov 16  }
 0x1f6   : > { %1590 = sst [smem:[#allocation14 + $0x1]] (%p2111_p7), %s1955_s3  ;;  %s1957_s18 = smov 128  }
 0x1f7   : > { %1591 = sst [smem:[#allocation14 + $0x2]] (%p2111_p7), %s1956_s21  ;;  %s1958_s22 = smov 8  }
 0x1f8   : > { %s1573_s28 = smul.u32 160, %s3019_s29  ;;  %1592 = sst [smem:[#allocation14 + $0x3]] (%p2111_p7), %s1957_s18 }
 0x1f9   : > { %1593 = sst [smem:[#allocation14 + $0x4]] (%p2111_p7), %s1957_s18  ;;  %s1959_s26 = smov [#allocation13]  }
 0x1fa   : > { %s1226_s7 = sadd.s32 %s1573_s28, %s1513_s2  ;;  %1594 = sst [smem:[#allocation14 + $0x5]] (%p2111_p7), %s1958_s22 }
 0x1fb   : > { %s1514_s6 = sshll.u32 %s1226_s7, 3  ;;  %s1960_s14 = smov 0  }
 0x1fc   : > { %s1228_s11 = scalar_lea.hbm %s3021_s13, %s1514_s6  ;;  %s1516_s5 = sshll.u32 %s3019_s29, 5 }
 0x1fd   : > { %s1241_s30 = sshll.u32 %s1228_s11, 4  ;;  %s1271_s28 = sshll.u32 %s2283_s8, 4  ;;  %s1242_s30 = int_to_ptr.hbm [resolvable:$true] %s1241_s30  ;;  %s1272_s28 = int_to_ptr.vmem [resolvable:$true] %s1271_s28 }
 0x1fe   : > { %1595 = dma.general (%p2111_p7), %s1240_s23, 10240, %s1242_s30, %s1210_s9, %s1959_s26, [#allocation14], %s1960_s14, 0  }
 0x1ff   : > { %s1268_s7 = sadd.s32 %s1516_s5, %s1513_s2  ;;  %s3022_s12 = sld [smem:[#allocation33_spill]] }
 0x200   : > { %s1517_s6 = sshll.u32 %s1268_s7, 3 }
 0x205   : > { %s1270_s13 = scalar_lea.hbm %s3022_s12, %s1517_s6  ;;  %s1829_s8 = scalar_lea.hbm %s3022_s12, 512 }
 0x206   : > { %s1273_s11 = sshll.u32 %s1270_s13, 4  ;;  %s1274_s11 = int_to_ptr.hbm [resolvable:$true] %s1273_s11 }
 0x207   : > { %s1823_s3 = sshra.s32 %s1274_s11, 4  ;;  %s1824_s3 = int_to_ptr.hbm [resolvable:$true] %s1823_s3 }
 0x208   : > { %s1825_s21 = scalar_lea.hbm %s1824_s3, 128  ;;  %p1830_p13 = scmp.lt.s32.totalorder %s1824_s3, %s3022_s12 }
 0x209   : > { %p1826_p5 = scmp.ne.s32.totalorder %s1824_s3, %s1825_s21  ;;  %p1831_p4 = scmp.lt.s32.totalorder %s1829_s8, %s1825_s21 }
 0x20b   : > { %p1827_p6 = pnand %p1826_p5, %p2111_p7  ;;  %p1832_p2 = por %p1831_p4, %p1830_p13 }
 0x20d   : > { %p1828_p12 = pneg %p1827_p6 }
 0x20f   : > { %p1833_p8 = pnand %p1832_p2, %p1828_p12 }
 0x211   : > { %1836 = shalt.err (!%p1833_p8)
}
 0x212   : > { %s1961_s30 = smov 128   ;;  %s1962_s18 = smov 8  }
 0x213   : > { %1596 = dma.vmem_to_hbm [thread:$0]  (%p2111_p7), %s1272_s28, 2048, %s1274_s11, %s1215_s10, %s1961_s30, %s1961_s30, %s1962_s18  }
 0x214 PF: > { %s3023_s22 = sld [smem:[#allocation21_spill]]  ;;  %p1612_p11 = scmp.ge.s32.totalorder %s1943_s25, 2 }
 0x216   : > { %p1604_p1 = pnand %p1612_p11, %p2119_p10 }
 0x218   : > { %p1605_p9 = pneg %p1604_p1 }
 0x21a   : > { %s1288_s14 = sand.u32 1, %s3023_s22  }
 0x21b   : > { %s1289_s5 = scalar_lea.sflag [#allocation4], %s1288_s14 }
 0x21c   : > { %1894 = dma.done.wait (%p1605_p9), %s1289_s5, 10240  }
 0x21d   : > { %1896 = vsyncadd (%p1605_p9), %s1289_s5, 4294957056  ;;  %s1299_s7 = scalar_lea.sflag [#allocation10], %s1288_s14 }
 0x21e   : > { %1898 = dma.done.wait (%p1605_p9), %s1299_s7, 2048  }
 0x21f   : > { %1900 = vsyncadd (%p1605_p9), %s1299_s7, 4294965248  ;;  %s27_s25 = sadd.s32 1, %s1943_s25   ;;  %s3025_s10 = sld [smem:[#allocation27_spill]] }
 0x220   : > { %p24_p0 = scmp.ge.s32.totalorder %s27_s25, 6   ;;  %s3026_s27 = sld [smem:[#allocation22_spill]] }
 0x221   : > { %s3027_s20 = sld [smem:[#allocation28_spill]]  ;;  %s3031_s15 = smov %s1907_s16 }
 0x222   : > { %s3028_s21 = sld [smem:[#allocation24_spill]]  ;;  %s3032_s16 = smov %s1911_s17 }
 0x223   : > { %s3029_s23 = sld [smem:[#allocation25_spill]]  ;;  %s3034_s18 = smov %s1919_s19 }
 0x224   : > { %s3030_s28 = sld [smem:[#allocation26_spill]]  ;;  %s3036_s22 = smov %s1939_s24 }
 0x225   : > { %s3033_s17 = smov %s3025_s10 }
 0x226   : > { %s3035_s19 = smov %s3026_s27  ;;  %26 = sbr.rel (!%p24_p0) target bundleno = 17 (0x11), region = 125 }
 0x22a   : > { %s3037_s24 = smov %s3030_s28 }
 0x22b   :  { %1305 = vsyncpa [#allocation3], 1 }
 0x22c   :  { %1307 = vsyncpa [#allocation3 + $0x1], 1 }
 0x22d   :  { %1308 = vsyncpa [#allocation6], 1 }
 0x22e   :  { %1310 = vsyncpa [#allocation6 + $0x1], 1 }
 0x22f   :  { %1311 = vsyncpa [#allocation4], 1 }
 0x230   :  { %1313 = vsyncpa [#allocation4 + $0x1], 1 }
 0x231   :  { %1314 = vsyncpa [#allocation10], 1 }
 0x232   :  { %1316 = vsyncpa [#allocation10 + $0x1], 1 }

</bundles_post_ra>
